<compile_context>
chip_gen: v5e
topology: v5e:2x2
jax: 0.10.0
libtpu: 0.0.40
codegen_flags: <defaults>
</compile_context>

<pallas_src>
import functools

import jax
import jax.numpy as jnp
from jax.experimental import pallas as pl
from jax.experimental.pallas import tpu as pltpu


def _round_up(n, m):
    return ((n + m - 1) // m) * m


def _vmem_limit_bytes():
    """Generation-aware VMEM budget: ~3/4 of physical VMEM, 48 MiB fallback."""
    cap = 64 * 1024 * 1024
    try:
        cap = int(pltpu.get_tpu_info().vmem_capacity_bytes)
    except Exception:
        pass
    return int(max(32 * 1024 * 1024, min(3 * cap // 4, 100 * 1024 * 1024)))


def _layernorm(x, g, b, eps=1e-5):
    mu = jnp.mean(x, axis=-1, keepdims=True)
    xc = x - mu
    var = jnp.mean(xc * xc, axis=-1, keepdims=True)
    return xc * jax.lax.rsqrt(var + eps) * g + b


# ---------------------------------------------------------------------------
# Kernel (single grid step; M = B*S rows)
# ---------------------------------------------------------------------------
def _score_decoder_kernel(
    B, S, D, H, hd, depth, Fd, N_pad, D_pad,
    # inputs
    emb_ref, maskinfo_ref, small_ref,
    wqkv_ref, wo_ref, w1_ref, w2_ref, w_heads_ref,
    # output
    out_ref,
):
    M = B * S

    # --- unpack the single small-parameter operand (static row offsets) ---
    def prow(r, w):
        return small_ref[r:r + 1, :w]                 # (1, w) f32

    ln0_g, ln0_b = prow(0, D), prow(1, D)
    lnf_g, lnf_b = prow(2 + 6 * depth, D), prow(3 + 6 * depth, D)
    b_heads = prow(4 + 6 * depth, N_pad)

    # --- token + scaled positional embeddings, pre-summed in the wrapper ---
    x = emb_ref[...]                                  # (M, D) f32

    # --- post_emb_norm; project_emb is nn.Identity (decoder_dim == dim) ---
    x = _layernorm(x, ln0_g, ln0_b)

    # --- block-diagonal (per-batch) causal + key-padding additive bias,
    #     built once per kernel invocation (batch folded into M) ---
    row = jax.lax.broadcasted_iota(jnp.int32, (M, M), 0)
    col = jax.lax.broadcasted_iota(jnp.int32, (M, M), 1)
    key_ok = maskinfo_ref[0:1, :] > 0.5               # (1, M) True = attend
    bid = maskinfo_ref[1:2, :]                        # (1, M) batch id (f32)
    same_batch = jnp.transpose(bid) == bid            # (M, M)
    keep = same_batch & (col <= row) & key_ok
    bias = jnp.where(keep, 0.0, -1e9).astype(jnp.float32)

    # --- attn_layers: pre-norm causal decoder stand-in ---
    for l in range(depth):
        base = 2 + 6 * l
        ln1_g, ln1_b = prow(base + 0, D), prow(base + 1, D)
        ln2_g, ln2_b = prow(base + 2, D), prow(base + 3, D)
        b1 = prow(base + 4, Fd)
        b2 = prow(base + 5, D)

        # fused QKV projection (1/sqrt(hd) folded into the Q columns)
        h = _layernorm(x, ln1_g, ln1_b).astype(jnp.bfloat16)
        qkv = jnp.dot(h, wqkv_ref[l],
                      preferred_element_type=jnp.float32).astype(jnp.bfloat16)

        # head-leading (H, M, hd) operands from lane slices + leading-axis
        # stack (no sublane transposes); einsums below are leading-batch-dim
        # batched matmuls.
        qh = jnp.stack([qkv[:, h_ * hd:(h_ + 1) * hd] for h_ in range(H)], 0)
        kh = jnp.stack([qkv[:, D + h_ * hd:D + (h_ + 1) * hd]
                        for h_ in range(H)], 0)
        vh = jnp.stack([qkv[:, 2 * D + h_ * hd:2 * D + (h_ + 1) * hd]
                        for h_ in range(H)], 0)

        s = jnp.einsum('hmd,hnd->hmn', qh, kh,
                       preferred_element_type=jnp.float32)     # (H, M, M)
        s = s + bias[None]
        s = s - jnp.max(s, axis=-1, keepdims=True)
        p = jnp.exp(s)
        denom = jnp.sum(p, axis=-1, keepdims=True)              # (H, M, 1)
        o = jnp.einsum('hmn,hnd->hmd', p.astype(jnp.bfloat16), vh,
                       preferred_element_type=jnp.float32)      # (H, M, hd)
        o = o * pl.reciprocal(denom, approx=True)               # EUP slot
        attn = jnp.concatenate([o[h_] for h_ in range(H)],
                               axis=-1).astype(jnp.bfloat16)    # (M, D)
        x = x + jnp.dot(attn, wo_ref[l], preferred_element_type=jnp.float32)

        # FFN block (pre-norm, GELU)
        h2 = _layernorm(x, ln2_g, ln2_b).astype(jnp.bfloat16)
        f = jnp.dot(h2, w1_ref[l], preferred_element_type=jnp.float32) + b1
        # TODO(synk): x_transformers default GELU is exact (erf); tanh approx here.
        f = jax.nn.gelu(f, approximate=True).astype(jnp.bfloat16)
        x = x + jnp.dot(f, w2_ref[l], preferred_element_type=jnp.float32) + b2

    # final norm of the decoder stack
    x = _layernorm(x, lnf_g, lnf_b)

    # --- fused 4-head logits + hidden state -> ONE lane-dense output slab ---
    logits = (jnp.dot(x.astype(jnp.bfloat16), w_heads_ref[...],
                      preferred_element_type=jnp.float32) + b_heads)
    parts = [logits, x]
    if D_pad > D:
        parts.append(jnp.zeros((M, D_pad - D), jnp.float32))
    out_ref[...] = jnp.concatenate(parts, axis=-1)              # (M, N_pad+D_pad)


# ---------------------------------------------------------------------------
# Wrapper
# ---------------------------------------------------------------------------
def score_transformer_forward(params, rhythms, pitchs, lifts, mask=None):
    """Returns (out_rhythms, out_pitchs, out_lifts, out_notes, x, None)."""
    B, S = rhythms.shape
    D = params["rhythm_emb"].shape[1]
    H = int(params["num_heads"])
    hd = D // H
    depth = params["wq"].shape[0]
    Fd = params["w1"].shape[2]
    NR = params["w_rhythm"].shape[1]
    NP = params["w_pitch"].shape[1]
    NL = params["w_lift"].shape[1]
    NN = params["w_note"].shape[1]
    N_tot = NR + NP + NL + NN
    N_pad = _round_up(N_tot, 128)
    D_pad = _round_up(D, 128)
    M = B * S
    W_out = N_pad + D_pad

    if mask is None:
        mask = jnp.ones((B, S), dtype=bool)

    # Memory-bound embedding gathers stay in XLA; pre-sum with the scaled
    # positional embedding and flatten batch into the matmul M dimension.
    emb = (jnp.take(params["rhythm_emb"], rhythms, axis=0)
           + jnp.take(params["pitch_emb"], pitchs, axis=0)
           + jnp.take(params["lift_emb"], lifts, axis=0)
           + (params["pos_emb"][:S] * (D ** -0.5))[None, :, :]).astype(jnp.float32)
    emb_flat = emb.reshape(M, D)

    # Key-padding mask + batch ids packed into one tiny (2, M) operand.
    maskinfo = jnp.stack(
        [mask.astype(jnp.float32).reshape(M),
         jnp.broadcast_to(jnp.arange(B, dtype=jnp.float32)[:, None],
                          (B, S)).reshape(M)],
        axis=0)

    # Fused QKV weight (1/sqrt(hd) folded into Q columns); bf16 MXU operands.
    wqkv = jnp.concatenate([params["wq"] * (hd ** -0.5),
                            params["wk"], params["wv"]],
                           axis=-1).astype(jnp.bfloat16)        # (depth, D, 3D)
    wo = params["wo"].astype(jnp.bfloat16)
    w1 = params["w1"].astype(jnp.bfloat16)
    w2 = params["w2"].astype(jnp.bfloat16)

    # Four output heads fused into one lane-dense 128-padded weight.
    w_heads = jnp.zeros((D, N_pad), jnp.float32).at[:, :N_tot].set(
        jnp.concatenate([params["w_rhythm"], params["w_pitch"],
                         params["w_lift"], params["w_note"]], axis=1)
    ).astype(jnp.bfloat16)
    b_heads = jnp.zeros((N_pad,), jnp.float32).at[:N_tot].set(
        jnp.concatenate([params["b_rhythm"], params["b_pitch"],
                         params["b_lift"], params["b_note"]], axis=1).reshape(-1))

    # Pack every small (LayerNorm / bias) parameter into ONE f32 operand.
    Wmax = max(D, Fd, N_pad)

    def pack_row(vec):
        vec = jnp.reshape(vec, (-1,)).astype(jnp.float32)
        return jnp.zeros((Wmax,), jnp.float32).at[:vec.shape[0]].set(vec)

    rows = [pack_row(params["ln0_g"]), pack_row(params["ln0_b"])]
    for l in range(depth):
        rows += [pack_row(params["ln1_g"][l]), pack_row(params["ln1_b"][l]),
                 pack_row(params["ln2_g"][l]), pack_row(params["ln2_b"][l]),
                 pack_row(params["b1"][l]), pack_row(params["b2"][l])]
    rows += [pack_row(params["lnf_g"]), pack_row(params["lnf_b"]),
             pack_row(b_heads)]
    small = jnp.stack(rows, axis=0)                              # (2+6*depth+3, Wmax)

    def full_spec(shape):
        nd = len(shape)
        return pl.BlockSpec(shape, lambda i: (0,) * nd)

    kernel = functools.partial(_score_decoder_kernel,
                               B, S, D, H, hd, depth, Fd, N_pad, D_pad)

    out = pl.pallas_call(
        kernel,
        out_shape=jax.ShapeDtypeStruct((M, W_out), jnp.float32),
        grid=(1,),
        in_specs=[
            full_spec(emb_flat.shape),
            full_spec(maskinfo.shape),
            full_spec(small.shape),
            full_spec(wqkv.shape),
            full_spec(wo.shape),
            full_spec(w1.shape),
            full_spec(w2.shape),
            full_spec(w_heads.shape),
        ],
        out_specs=full_spec((M, W_out)),
        compiler_params=pltpu.CompilerParams(
            dimension_semantics=("arbitrary",),
            vmem_limit_bytes=_vmem_limit_bytes()),
    )(emb_flat, maskinfo, small, wqkv, wo, w1, w2, w_heads)

    out = out.reshape(B, S, W_out)
    out_rhythms = out[..., :NR]
    out_pitchs = out[..., NR:NR + NP]
    out_lifts = out[..., NR + NP:NR + NP + NL]
    out_notes = out[..., NR + NP + NL:N_tot]
    x = out[..., N_pad:N_pad + D]
    return out_rhythms, out_pitchs, out_lifts, out_notes, x, None


# ---------------------------------------------------------------------------
# Deterministic parameter init (synthetic, not a checkpoint)
# ---------------------------------------------------------------------------
def init_params(key, *, D=32, depth=2, heads=2, max_seq_len=8, ff_mult=4,
                n_lift=5, n_pitch=7, n_rhythm=9, n_note=3):
    Fd = ff_mult * D
    ks = jax.random.split(key, 20)

    def nrm(k, shape, std=0.02):
        return (jax.random.normal(k, shape) * std).astype(jnp.float32)

    params = {
        "num_heads": heads,
        "lift_emb": nrm(ks[0], (n_lift, D)),
        "pitch_emb": nrm(ks[1], (n_pitch, D)),
        "rhythm_emb": nrm(ks[2], (n_rhythm, D)),
        "pos_emb": nrm(ks[3], (max_seq_len, D)),
        "ln0_g": jnp.ones((1, D), jnp.float32),
        "ln0_b": jnp.zeros((1, D), jnp.float32),
        "ln1_g": jnp.ones((depth, 1, D), jnp.float32),
        "ln1_b": jnp.zeros((depth, 1, D), jnp.float32),
        "wq": nrm(ks[4], (depth, D, D)),
        "wk": nrm(ks[5], (depth, D, D)),
        "wv": nrm(ks[6], (depth, D, D)),
        "wo": nrm(ks[7], (depth, D, D)),
        "ln2_g": jnp.ones((depth, 1, D), jnp.float32),
        "ln2_b": jnp.zeros((depth, 1, D), jnp.float32),
        "w1": nrm(ks[8], (depth, D, Fd)),
        "b1": jnp.zeros((depth, 1, Fd), jnp.float32),
        "w2": nrm(ks[9], (depth, Fd, D)),
        "b2": jnp.zeros((depth, 1, D), jnp.float32),
        "lnf_g": jnp.ones((1, D), jnp.float32),
        "lnf_b": jnp.zeros((1, D), jnp.float32),
        "w_rhythm": nrm(ks[10], (D, n_rhythm)),
        "b_rhythm": nrm(ks[11], (1, n_rhythm)),
        "w_pitch": nrm(ks[12], (D, n_pitch)),
        "b_pitch": nrm(ks[13], (1, n_pitch)),
        "w_lift": nrm(ks[14], (D, n_lift)),
        "b_lift": nrm(ks[15], (1, n_lift)),
        "w_note": nrm(ks[16], (D, n_note)),
        "b_note": nrm(ks[17], (1, n_note)),
    }
    return params


if __name__ == "__main__":
    B, S, D = 2, 8, 32
    n_lift, n_pitch, n_rhythm, n_note = 5, 7, 9, 3

    key = jax.random.PRNGKey(0)
    kp, kr, kpi, kl = jax.random.split(key, 4)

    params = init_params(kp, D=D, max_seq_len=S,
                         n_lift=n_lift, n_pitch=n_pitch,
                         n_rhythm=n_rhythm, n_note=n_note)

    rhythms = jax.random.randint(kr, (B, S), 0, n_rhythm, dtype=jnp.int32)
    pitchs = jax.random.randint(kpi, (B, S), 0, n_pitch, dtype=jnp.int32)
    lifts = jax.random.randint(kl, (B, S), 0, n_lift, dtype=jnp.int32)
    # padding mask: batch 0 full length, batch 1 has last 2 positions padded
    lengths = jnp.array([[S], [S - 2]], dtype=jnp.int32)
    mask = jnp.arange(S, dtype=jnp.int32)[None, :] < lengths

    out_rhythms, out_pitchs, out_lifts, out_notes, x, center = (
        score_transformer_forward(params, rhythms, pitchs, lifts, mask))

    jax.block_until_ready((out_rhythms, out_pitchs, out_lifts, out_notes, x))
    assert out_rhythms.shape == (B, S, n_rhythm)
    assert out_pitchs.shape == (B, S, n_pitch)
    assert out_lifts.shape == (B, S, n_lift)
    assert out_notes.shape == (B, S, n_note)
    assert x.shape == (B, S, D)
    assert center is None
    assert bool(jnp.all(jnp.isfinite(out_rhythms)))
    assert bool(jnp.all(jnp.isfinite(x)))
    print("KERNEL_OK")
</pallas_src>

<mosaic_0001>
module attributes {stable_mosaic.version = 11 : i64} {
  func.func @_score_decoder_kernel(%arg0: i32, %arg1: memref<16x32xf32, #tpu.memory_space<vmem>>, %arg2: memref<2x16xf32, #tpu.memory_space<vmem>>, %arg3: memref<17x128xf32, #tpu.memory_space<vmem>>, %arg4: memref<2x32x96xbf16, #tpu.memory_space<vmem>>, %arg5: memref<2x32x32xbf16, #tpu.memory_space<vmem>>, %arg6: memref<2x32x128xbf16, #tpu.memory_space<vmem>>, %arg7: memref<2x128x32xbf16, #tpu.memory_space<vmem>>, %arg8: memref<32x128xbf16, #tpu.memory_space<vmem>>, %arg9: memref<16x256xf32, #tpu.memory_space<vmem>>) attributes {dimension_semantics = [#tpu.dimension_semantics<arbitrary>], iteration_bounds = array<i64: 1>, scalar_prefetch = 0 : i64, scratch_operands = 0 : i64, tpu.core_type = #tpu.core_type<tc>, window_params = [{pipeline_mode = #tpu.pipeline_mode<synchronous>, transform_indices = @transform_0, window_bounds = array<i64: 16, 32>}, {pipeline_mode = #tpu.pipeline_mode<synchronous>, transform_indices = @transform_1, window_bounds = array<i64: 2, 16>}, {pipeline_mode = #tpu.pipeline_mode<synchronous>, transform_indices = @transform_2, window_bounds = array<i64: 17, 128>}, {pipeline_mode = #tpu.pipeline_mode<synchronous>, transform_indices = @transform_3, window_bounds = array<i64: 2, 32, 96>}, {pipeline_mode = #tpu.pipeline_mode<synchronous>, transform_indices = @transform_4, window_bounds = array<i64: 2, 32, 32>}, {pipeline_mode = #tpu.pipeline_mode<synchronous>, transform_indices = @transform_5, window_bounds = array<i64: 2, 32, 128>}, {pipeline_mode = #tpu.pipeline_mode<synchronous>, transform_indices = @transform_6, window_bounds = array<i64: 2, 128, 32>}, {pipeline_mode = #tpu.pipeline_mode<synchronous>, transform_indices = @transform_7, window_bounds = array<i64: 32, 128>}, {pipeline_mode = #tpu.pipeline_mode<synchronous>, transform_indices = @transform_8, window_bounds = array<i64: 16, 256>}]} {
    %c0 = arith.constant 0 : index
    %c0_0 = arith.constant 0 : index
    %0 = vector.load %arg3[%c0, %c0_0] : memref<17x128xf32, #tpu.memory_space<vmem>>, vector<1x32xf32>
    %c1 = arith.constant 1 : index
    %c0_1 = arith.constant 0 : index
    %1 = vector.load %arg3[%c1, %c0_1] : memref<17x128xf32, #tpu.memory_space<vmem>>, vector<1x32xf32>
    %c14 = arith.constant 14 : index
    %c0_2 = arith.constant 0 : index
    %2 = vector.load %arg3[%c14, %c0_2] : memref<17x128xf32, #tpu.memory_space<vmem>>, vector<1x32xf32>
    %c15 = arith.constant 15 : index
    %c0_3 = arith.constant 0 : index
    %3 = vector.load %arg3[%c15, %c0_3] : memref<17x128xf32, #tpu.memory_space<vmem>>, vector<1x32xf32>
    %c16 = arith.constant 16 : index
    %c0_4 = arith.constant 0 : index
    %4 = vector.load %arg3[%c16, %c0_4] : memref<17x128xf32, #tpu.memory_space<vmem>>, vector<1x128xf32>
    %c0_5 = arith.constant 0 : index
    %c0_6 = arith.constant 0 : index
    %5 = vector.load %arg1[%c0_5, %c0_6] : memref<16x32xf32, #tpu.memory_space<vmem>>, vector<16x32xf32>
    %cst = arith.constant dense<0.000000e+00> : vector<16xf32>
    %6 = vector.multi_reduction <add>, %5, %cst [1] : vector<16x32xf32> to vector<16xf32>
    %7 = vector.shape_cast %6 : vector<16xf32> to vector<16x1xf32>
    %cst_7 = arith.constant 3.200000e+01 : f32
    %8 = vector.broadcast %cst_7 : f32 to vector<16x1xf32>
    %9 = arith.divf %7, %8 : vector<16x1xf32>
    %10 = vector.broadcast %9 : vector<16x1xf32> to vector<16x32xf32>
    %11 = arith.subf %5, %10 : vector<16x32xf32>
    %12 = arith.mulf %11, %11 : vector<16x32xf32>
    %cst_8 = arith.constant dense<0.000000e+00> : vector<16xf32>
    %13 = vector.multi_reduction <add>, %12, %cst_8 [1] : vector<16x32xf32> to vector<16xf32>
    %14 = vector.shape_cast %13 : vector<16xf32> to vector<16x1xf32>
    %cst_9 = arith.constant 3.200000e+01 : f32
    %15 = vector.broadcast %cst_9 : f32 to vector<16x1xf32>
    %16 = arith.divf %14, %15 : vector<16x1xf32>
    %cst_10 = arith.constant 9.99999974E-6 : f32
    %17 = vector.broadcast %cst_10 : f32 to vector<16x1xf32>
    %18 = arith.addf %16, %17 : vector<16x1xf32>
    %19 = math.rsqrt %18 : vector<16x1xf32>
    %20 = vector.broadcast %19 : vector<16x1xf32> to vector<16x32xf32>
    %21 = arith.mulf %11, %20 : vector<16x32xf32>
    %22 = vector.broadcast %0 : vector<1x32xf32> to vector<16x32xf32>
    %23 = arith.mulf %21, %22 : vector<16x32xf32>
    %24 = vector.broadcast %1 : vector<1x32xf32> to vector<16x32xf32>
    %25 = arith.addf %23, %24 : vector<16x32xf32>
    %26 = tpu.iota {dimensions = array<i32: 0>} : vector<16x16xi32>
    %27 = tpu.iota {dimensions = array<i32: 1>} : vector<16x16xi32>
    %c0_11 = arith.constant 0 : index
    %c0_12 = arith.constant 0 : index
    %28 = vector.load %arg2[%c0_11, %c0_12] : memref<2x16xf32, #tpu.memory_space<vmem>>, vector<1x16xf32>
    %cst_13 = arith.constant 5.000000e-01 : f32
    %29 = vector.broadcast %cst_13 : f32 to vector<1x16xf32>
    %30 = arith.cmpf ogt, %28, %29 : vector<1x16xf32>
    %c1_14 = arith.constant 1 : index
    %c0_15 = arith.constant 0 : index
    %31 = vector.load %arg2[%c1_14, %c0_15] : memref<2x16xf32, #tpu.memory_space<vmem>>, vector<1x16xf32>
    %32 = tpu.transpose %31, [1, 0] : vector<1x16xf32> -> vector<16x1xf32>
    %33 = vector.broadcast %32 : vector<16x1xf32> to vector<16x16xf32>
    %34 = vector.broadcast %31 : vector<1x16xf32> to vector<16x16xf32>
    %35 = arith.cmpf oeq, %33, %34 : vector<16x16xf32>
    %36 = arith.cmpi sle, %27, %26 : vector<16x16xi32>
    %37 = arith.andi %35, %36 : vector<16x16xi1>
    %38 = vector.broadcast %30 : vector<1x16xi1> to vector<16x16xi1>
    %39 = arith.andi %37, %38 : vector<16x16xi1>
    %cst_16 = arith.constant 0.000000e+00 : f32
    %cst_17 = arith.constant -1.000000e+09 : f32
    %40 = vector.broadcast %cst_16 : f32 to vector<16x16xf32>
    %41 = vector.broadcast %cst_17 : f32 to vector<16x16xf32>
    %42 = arith.select %39, %40, %41 : vector<16x16xi1>, vector<16x16xf32>
    %c2 = arith.constant 2 : index
    %c0_18 = arith.constant 0 : index
    %43 = vector.load %arg3[%c2, %c0_18] : memref<17x128xf32, #tpu.memory_space<vmem>>, vector<1x32xf32>
    %c3 = arith.constant 3 : index
    %c0_19 = arith.constant 0 : index
    %44 = vector.load %arg3[%c3, %c0_19] : memref<17x128xf32, #tpu.memory_space<vmem>>, vector<1x32xf32>
    %c4 = arith.constant 4 : index
    %c0_20 = arith.constant 0 : index
    %45 = vector.load %arg3[%c4, %c0_20] : memref<17x128xf32, #tpu.memory_space<vmem>>, vector<1x32xf32>
    %c5 = arith.constant 5 : index
    %c0_21 = arith.constant 0 : index
    %46 = vector.load %arg3[%c5, %c0_21] : memref<17x128xf32, #tpu.memory_space<vmem>>, vector<1x32xf32>
    %c6 = arith.constant 6 : index
    %c0_22 = arith.constant 0 : index
    %47 = vector.load %arg3[%c6, %c0_22] : memref<17x128xf32, #tpu.memory_space<vmem>>, vector<1x128xf32>
    %c7 = arith.constant 7 : index
    %c0_23 = arith.constant 0 : index
    %48 = vector.load %arg3[%c7, %c0_23] : memref<17x128xf32, #tpu.memory_space<vmem>>, vector<1x32xf32>
    %cst_24 = arith.constant dense<0.000000e+00> : vector<16xf32>
    %49 = vector.multi_reduction <add>, %25, %cst_24 [1] : vector<16x32xf32> to vector<16xf32>
    %50 = vector.shape_cast %49 : vector<16xf32> to vector<16x1xf32>
    %cst_25 = arith.constant 3.200000e+01 : f32
    %51 = vector.broadcast %cst_25 : f32 to vector<16x1xf32>
    %52 = arith.divf %50, %51 : vector<16x1xf32>
    %53 = vector.broadcast %52 : vector<16x1xf32> to vector<16x32xf32>
    %54 = arith.subf %25, %53 : vector<16x32xf32>
    %55 = arith.mulf %54, %54 : vector<16x32xf32>
    %cst_26 = arith.constant dense<0.000000e+00> : vector<16xf32>
    %56 = vector.multi_reduction <add>, %55, %cst_26 [1] : vector<16x32xf32> to vector<16xf32>
    %57 = vector.shape_cast %56 : vector<16xf32> to vector<16x1xf32>
    %cst_27 = arith.constant 3.200000e+01 : f32
    %58 = vector.broadcast %cst_27 : f32 to vector<16x1xf32>
    %59 = arith.divf %57, %58 : vector<16x1xf32>
    %cst_28 = arith.constant 9.99999974E-6 : f32
    %60 = vector.broadcast %cst_28 : f32 to vector<16x1xf32>
    %61 = arith.addf %59, %60 : vector<16x1xf32>
    %62 = math.rsqrt %61 : vector<16x1xf32>
    %63 = vector.broadcast %62 : vector<16x1xf32> to vector<16x32xf32>
    %64 = arith.mulf %54, %63 : vector<16x32xf32>
    %65 = vector.broadcast %43 : vector<1x32xf32> to vector<16x32xf32>
    %66 = arith.mulf %64, %65 : vector<16x32xf32>
    %67 = vector.broadcast %44 : vector<1x32xf32> to vector<16x32xf32>
    %68 = arith.addf %66, %67 : vector<16x32xf32>
    %69 = arith.truncf %68 : vector<16x32xf32> to vector<16x32xbf16>
    %c0_29 = arith.constant 0 : index
    %c0_30 = arith.constant 0 : index
    %c0_31 = arith.constant 0 : index
    %70 = vector.load %arg4[%c0_29, %c0_30, %c0_31] : memref<2x32x96xbf16, #tpu.memory_space<vmem>>, vector<1x32x96xbf16>
    %71 = vector.shape_cast %70 : vector<1x32x96xbf16> to vector<32x96xbf16>
    %cst_32 = arith.constant dense<0.000000e+00> : vector<16x96xf32>
    %72 = tpu.matmul %69, %71, %cst_32 {dimension_numbers = #tpu.dot_dimension_numbers<[1], [0], [0], [1], [0, 0, 1, 1], [], []>} : vector<16x32xbf16>, vector<32x96xbf16>, vector<16x96xf32> -> vector<16x96xf32>
    %73 = arith.truncf %72 : vector<16x96xf32> to vector<16x96xbf16>
    %74 = vector.extract_strided_slice %73 {offsets = [0, 0], sizes = [16, 16], strides = [1, 1]} : vector<16x96xbf16> to vector<16x16xbf16>
    %75 = vector.extract_strided_slice %73 {offsets = [0, 16], sizes = [16, 16], strides = [1, 1]} : vector<16x96xbf16> to vector<16x16xbf16>
    %76 = vector.shape_cast %74 : vector<16x16xbf16> to vector<1x16x16xbf16>
    %77 = vector.shape_cast %75 : vector<16x16xbf16> to vector<1x16x16xbf16>
    %78 = tpu.concatenate %76, %77 in 0 : vector<1x16x16xbf16>, vector<1x16x16xbf16> -> vector<2x16x16xbf16>
    %79 = vector.extract_strided_slice %73 {offsets = [0, 32], sizes = [16, 16], strides = [1, 1]} : vector<16x96xbf16> to vector<16x16xbf16>
    %80 = vector.extract_strided_slice %73 {offsets = [0, 48], sizes = [16, 16], strides = [1, 1]} : vector<16x96xbf16> to vector<16x16xbf16>
    %81 = vector.shape_cast %79 : vector<16x16xbf16> to vector<1x16x16xbf16>
    %82 = vector.shape_cast %80 : vector<16x16xbf16> to vector<1x16x16xbf16>
    %83 = tpu.concatenate %81, %82 in 0 : vector<1x16x16xbf16>, vector<1x16x16xbf16> -> vector<2x16x16xbf16>
    %84 = vector.extract_strided_slice %73 {offsets = [0, 64], sizes = [16, 16], strides = [1, 1]} : vector<16x96xbf16> to vector<16x16xbf16>
    %85 = vector.extract_strided_slice %73 {offsets = [0, 80], sizes = [16, 16], strides = [1, 1]} : vector<16x96xbf16> to vector<16x16xbf16>
    %86 = vector.shape_cast %84 : vector<16x16xbf16> to vector<1x16x16xbf16>
    %87 = vector.shape_cast %85 : vector<16x16xbf16> to vector<1x16x16xbf16>
    %88 = tpu.concatenate %86, %87 in 0 : vector<1x16x16xbf16>, vector<1x16x16xbf16> -> vector<2x16x16xbf16>
    "tpu.trace_start"() <{level = 10 : i32, message = "hmd,hnd->hmn"}> : () -> ()
    %cst_33 = arith.constant dense<0.000000e+00> : vector<2x16x16xf32>
    %89 = tpu.matmul %78, %83, %cst_33 {dimension_numbers = #tpu.dot_dimension_numbers<[2], [2], [1], [1], [0, 0, 0, 1, 1, 1], [0], [0]>} : vector<2x16x16xbf16>, vector<2x16x16xbf16>, vector<2x16x16xf32> -> vector<2x16x16xf32>
    "tpu.trace_stop"() : () -> ()
    %90 = vector.shape_cast %42 : vector<16x16xf32> to vector<1x16x16xf32>
    %91 = vector.broadcast %90 : vector<1x16x16xf32> to vector<2x16x16xf32>
    %92 = arith.addf %89, %91 : vector<2x16x16xf32>
    %cst_34 = arith.constant dense<0xFF800000> : vector<2x16xf32>
    %93 = vector.multi_reduction <maximumf>, %92, %cst_34 [2] : vector<2x16x16xf32> to vector<2x16xf32>
    %94 = vector.shape_cast %93 : vector<2x16xf32> to vector<2x16x1xf32>
    %95 = vector.broadcast %94 : vector<2x16x1xf32> to vector<2x16x16xf32>
    %96 = arith.subf %92, %95 : vector<2x16x16xf32>
    %97 = math.exp %96 : vector<2x16x16xf32>
    %cst_35 = arith.constant dense<0.000000e+00> : vector<2x16xf32>
    %98 = vector.multi_reduction <add>, %97, %cst_35 [2] : vector<2x16x16xf32> to vector<2x16xf32>
    %99 = vector.shape_cast %98 : vector<2x16xf32> to vector<2x16x1xf32>
    %100 = arith.truncf %97 : vector<2x16x16xf32> to vector<2x16x16xbf16>
    "tpu.trace_start"() <{level = 10 : i32, message = "hmn,hnd->hmd"}> : () -> ()
    %cst_36 = arith.constant dense<0.000000e+00> : vector<2x16x16xf32>
    %101 = tpu.matmul %100, %88, %cst_36 {dimension_numbers = #tpu.dot_dimension_numbers<[2], [1], [1], [2], [0, 0, 0, 1, 1, 2], [0], [0]>} : vector<2x16x16xbf16>, vector<2x16x16xbf16>, vector<2x16x16xf32> -> vector<2x16x16xf32>
    "tpu.trace_stop"() : () -> ()
    %102 = tpu.reciprocal %99 {approx = true} : vector<2x16x1xf32> -> vector<2x16x1xf32>
    %103 = vector.broadcast %102 : vector<2x16x1xf32> to vector<2x16x16xf32>
    %104 = arith.mulf %101, %103 : vector<2x16x16xf32>
    %105 = vector.extract_strided_slice %104 {offsets = [0, 0, 0], sizes = [1, 16, 16], strides = [1, 1, 1]} : vector<2x16x16xf32> to vector<1x16x16xf32>
    %106 = vector.shape_cast %105 : vector<1x16x16xf32> to vector<16x16xf32>
    %107 = vector.extract_strided_slice %104 {offsets = [1, 0, 0], sizes = [1, 16, 16], strides = [1, 1, 1]} : vector<2x16x16xf32> to vector<1x16x16xf32>
    %108 = vector.shape_cast %107 : vector<1x16x16xf32> to vector<16x16xf32>
    %109 = tpu.concatenate %106, %108 in 1 : vector<16x16xf32>, vector<16x16xf32> -> vector<16x32xf32>
    %110 = arith.truncf %109 : vector<16x32xf32> to vector<16x32xbf16>
    %c0_37 = arith.constant 0 : index
    %c0_38 = arith.constant 0 : index
    %c0_39 = arith.constant 0 : index
    %111 = vector.load %arg5[%c0_37, %c0_38, %c0_39] : memref<2x32x32xbf16, #tpu.memory_space<vmem>>, vector<1x32x32xbf16>
    %112 = vector.shape_cast %111 : vector<1x32x32xbf16> to vector<32x32xbf16>
    %cst_40 = arith.constant dense<0.000000e+00> : vector<16x32xf32>
    %113 = tpu.matmul %110, %112, %cst_40 {dimension_numbers = #tpu.dot_dimension_numbers<[1], [0], [0], [1], [0, 0, 1, 1], [], []>} : vector<16x32xbf16>, vector<32x32xbf16>, vector<16x32xf32> -> vector<16x32xf32>
    %114 = arith.addf %25, %113 : vector<16x32xf32>
    %cst_41 = arith.constant dense<0.000000e+00> : vector<16xf32>
    %115 = vector.multi_reduction <add>, %114, %cst_41 [1] : vector<16x32xf32> to vector<16xf32>
    %116 = vector.shape_cast %115 : vector<16xf32> to vector<16x1xf32>
    %cst_42 = arith.constant 3.200000e+01 : f32
    %117 = vector.broadcast %cst_42 : f32 to vector<16x1xf32>
    %118 = arith.divf %116, %117 : vector<16x1xf32>
    %119 = vector.broadcast %118 : vector<16x1xf32> to vector<16x32xf32>
    %120 = arith.subf %114, %119 : vector<16x32xf32>
    %121 = arith.mulf %120, %120 : vector<16x32xf32>
    %cst_43 = arith.constant dense<0.000000e+00> : vector<16xf32>
    %122 = vector.multi_reduction <add>, %121, %cst_43 [1] : vector<16x32xf32> to vector<16xf32>
    %123 = vector.shape_cast %122 : vector<16xf32> to vector<16x1xf32>
    %cst_44 = arith.constant 3.200000e+01 : f32
    %124 = vector.broadcast %cst_44 : f32 to vector<16x1xf32>
    %125 = arith.divf %123, %124 : vector<16x1xf32>
    %cst_45 = arith.constant 9.99999974E-6 : f32
    %126 = vector.broadcast %cst_45 : f32 to vector<16x1xf32>
    %127 = arith.addf %125, %126 : vector<16x1xf32>
    %128 = math.rsqrt %127 : vector<16x1xf32>
    %129 = vector.broadcast %128 : vector<16x1xf32> to vector<16x32xf32>
    %130 = arith.mulf %120, %129 : vector<16x32xf32>
    %131 = vector.broadcast %45 : vector<1x32xf32> to vector<16x32xf32>
    %132 = arith.mulf %130, %131 : vector<16x32xf32>
    %133 = vector.broadcast %46 : vector<1x32xf32> to vector<16x32xf32>
    %134 = arith.addf %132, %133 : vector<16x32xf32>
    %135 = arith.truncf %134 : vector<16x32xf32> to vector<16x32xbf16>
    %c0_46 = arith.constant 0 : index
    %c0_47 = arith.constant 0 : index
    %c0_48 = arith.constant 0 : index
    %136 = vector.load %arg6[%c0_46, %c0_47, %c0_48] : memref<2x32x128xbf16, #tpu.memory_space<vmem>>, vector<1x32x128xbf16>
    %137 = vector.shape_cast %136 : vector<1x32x128xbf16> to vector<32x128xbf16>
    %cst_49 = arith.constant dense<0.000000e+00> : vector<16x128xf32>
    %138 = tpu.matmul %135, %137, %cst_49 {dimension_numbers = #tpu.dot_dimension_numbers<[1], [0], [0], [1], [0, 0, 1, 1], [], []>} : vector<16x32xbf16>, vector<32x128xbf16>, vector<16x128xf32> -> vector<16x128xf32>
    %139 = vector.broadcast %47 : vector<1x128xf32> to vector<16x128xf32>
    %140 = arith.addf %138, %139 : vector<16x128xf32>
    %141 = arith.mulf %140, %140 : vector<16x128xf32>
    %142 = arith.mulf %140, %141 : vector<16x128xf32>
    %cst_50 = arith.constant 4.471500e-02 : f32
    %143 = vector.broadcast %cst_50 : f32 to vector<16x128xf32>
    %144 = arith.mulf %143, %142 : vector<16x128xf32>
    %145 = arith.addf %140, %144 : vector<16x128xf32>
    %cst_51 = arith.constant 0.797884583 : f32
    %146 = vector.broadcast %cst_51 : f32 to vector<16x128xf32>
    %147 = arith.mulf %146, %145 : vector<16x128xf32>
    %148 = math.tanh %147 : vector<16x128xf32>
    %cst_52 = arith.constant 1.000000e+00 : f32
    %149 = vector.broadcast %cst_52 : f32 to vector<16x128xf32>
    %150 = arith.addf %149, %148 : vector<16x128xf32>
    %cst_53 = arith.constant 5.000000e-01 : f32
    %151 = vector.broadcast %cst_53 : f32 to vector<16x128xf32>
    %152 = arith.mulf %151, %150 : vector<16x128xf32>
    %153 = arith.mulf %140, %152 : vector<16x128xf32>
    %154 = arith.truncf %153 : vector<16x128xf32> to vector<16x128xbf16>
    %c0_54 = arith.constant 0 : index
    %c0_55 = arith.constant 0 : index
    %c0_56 = arith.constant 0 : index
    %155 = vector.load %arg7[%c0_54, %c0_55, %c0_56] : memref<2x128x32xbf16, #tpu.memory_space<vmem>>, vector<1x128x32xbf16>
    %156 = vector.shape_cast %155 : vector<1x128x32xbf16> to vector<128x32xbf16>
    %cst_57 = arith.constant dense<0.000000e+00> : vector<16x32xf32>
    %157 = tpu.matmul %154, %156, %cst_57 {dimension_numbers = #tpu.dot_dimension_numbers<[1], [0], [0], [1], [0, 0, 1, 1], [], []>} : vector<16x128xbf16>, vector<128x32xbf16>, vector<16x32xf32> -> vector<16x32xf32>
    %158 = arith.addf %114, %157 : vector<16x32xf32>
    %159 = vector.broadcast %48 : vector<1x32xf32> to vector<16x32xf32>
    %160 = arith.addf %158, %159 : vector<16x32xf32>
    %c8 = arith.constant 8 : index
    %c0_58 = arith.constant 0 : index
    %161 = vector.load %arg3[%c8, %c0_58] : memref<17x128xf32, #tpu.memory_space<vmem>>, vector<1x32xf32>
    %c9 = arith.constant 9 : index
    %c0_59 = arith.constant 0 : index
    %162 = vector.load %arg3[%c9, %c0_59] : memref<17x128xf32, #tpu.memory_space<vmem>>, vector<1x32xf32>
    %c10 = arith.constant 10 : index
    %c0_60 = arith.constant 0 : index
    %163 = vector.load %arg3[%c10, %c0_60] : memref<17x128xf32, #tpu.memory_space<vmem>>, vector<1x32xf32>
    %c11 = arith.constant 11 : index
    %c0_61 = arith.constant 0 : index
    %164 = vector.load %arg3[%c11, %c0_61] : memref<17x128xf32, #tpu.memory_space<vmem>>, vector<1x32xf32>
    %c12 = arith.constant 12 : index
    %c0_62 = arith.constant 0 : index
    %165 = vector.load %arg3[%c12, %c0_62] : memref<17x128xf32, #tpu.memory_space<vmem>>, vector<1x128xf32>
    %c13 = arith.constant 13 : index
    %c0_63 = arith.constant 0 : index
    %166 = vector.load %arg3[%c13, %c0_63] : memref<17x128xf32, #tpu.memory_space<vmem>>, vector<1x32xf32>
    %cst_64 = arith.constant dense<0.000000e+00> : vector<16xf32>
    %167 = vector.multi_reduction <add>, %160, %cst_64 [1] : vector<16x32xf32> to vector<16xf32>
    %168 = vector.shape_cast %167 : vector<16xf32> to vector<16x1xf32>
    %cst_65 = arith.constant 3.200000e+01 : f32
    %169 = vector.broadcast %cst_65 : f32 to vector<16x1xf32>
    %170 = arith.divf %168, %169 : vector<16x1xf32>
    %171 = vector.broadcast %170 : vector<16x1xf32> to vector<16x32xf32>
    %172 = arith.subf %160, %171 : vector<16x32xf32>
    %173 = arith.mulf %172, %172 : vector<16x32xf32>
    %cst_66 = arith.constant dense<0.000000e+00> : vector<16xf32>
    %174 = vector.multi_reduction <add>, %173, %cst_66 [1] : vector<16x32xf32> to vector<16xf32>
    %175 = vector.shape_cast %174 : vector<16xf32> to vector<16x1xf32>
    %cst_67 = arith.constant 3.200000e+01 : f32
    %176 = vector.broadcast %cst_67 : f32 to vector<16x1xf32>
    %177 = arith.divf %175, %176 : vector<16x1xf32>
    %cst_68 = arith.constant 9.99999974E-6 : f32
    %178 = vector.broadcast %cst_68 : f32 to vector<16x1xf32>
    %179 = arith.addf %177, %178 : vector<16x1xf32>
    %180 = math.rsqrt %179 : vector<16x1xf32>
    %181 = vector.broadcast %180 : vector<16x1xf32> to vector<16x32xf32>
    %182 = arith.mulf %172, %181 : vector<16x32xf32>
    %183 = vector.broadcast %161 : vector<1x32xf32> to vector<16x32xf32>
    %184 = arith.mulf %182, %183 : vector<16x32xf32>
    %185 = vector.broadcast %162 : vector<1x32xf32> to vector<16x32xf32>
    %186 = arith.addf %184, %185 : vector<16x32xf32>
    %187 = arith.truncf %186 : vector<16x32xf32> to vector<16x32xbf16>
    %c1_69 = arith.constant 1 : index
    %c0_70 = arith.constant 0 : index
    %c0_71 = arith.constant 0 : index
    %188 = vector.load %arg4[%c1_69, %c0_70, %c0_71] : memref<2x32x96xbf16, #tpu.memory_space<vmem>>, vector<1x32x96xbf16>
    %189 = vector.shape_cast %188 : vector<1x32x96xbf16> to vector<32x96xbf16>
    %cst_72 = arith.constant dense<0.000000e+00> : vector<16x96xf32>
    %190 = tpu.matmul %187, %189, %cst_72 {dimension_numbers = #tpu.dot_dimension_numbers<[1], [0], [0], [1], [0, 0, 1, 1], [], []>} : vector<16x32xbf16>, vector<32x96xbf16>, vector<16x96xf32> -> vector<16x96xf32>
    %191 = arith.truncf %190 : vector<16x96xf32> to vector<16x96xbf16>
    %192 = vector.extract_strided_slice %191 {offsets = [0, 0], sizes = [16, 16], strides = [1, 1]} : vector<16x96xbf16> to vector<16x16xbf16>
    %193 = vector.extract_strided_slice %191 {offsets = [0, 16], sizes = [16, 16], strides = [1, 1]} : vector<16x96xbf16> to vector<16x16xbf16>
    %194 = vector.shape_cast %192 : vector<16x16xbf16> to vector<1x16x16xbf16>
    %195 = vector.shape_cast %193 : vector<16x16xbf16> to vector<1x16x16xbf16>
    %196 = tpu.concatenate %194, %195 in 0 : vector<1x16x16xbf16>, vector<1x16x16xbf16> -> vector<2x16x16xbf16>
    %197 = vector.extract_strided_slice %191 {offsets = [0, 32], sizes = [16, 16], strides = [1, 1]} : vector<16x96xbf16> to vector<16x16xbf16>
    %198 = vector.extract_strided_slice %191 {offsets = [0, 48], sizes = [16, 16], strides = [1, 1]} : vector<16x96xbf16> to vector<16x16xbf16>
    %199 = vector.shape_cast %197 : vector<16x16xbf16> to vector<1x16x16xbf16>
    %200 = vector.shape_cast %198 : vector<16x16xbf16> to vector<1x16x16xbf16>
    %201 = tpu.concatenate %199, %200 in 0 : vector<1x16x16xbf16>, vector<1x16x16xbf16> -> vector<2x16x16xbf16>
    %202 = vector.extract_strided_slice %191 {offsets = [0, 64], sizes = [16, 16], strides = [1, 1]} : vector<16x96xbf16> to vector<16x16xbf16>
    %203 = vector.extract_strided_slice %191 {offsets = [0, 80], sizes = [16, 16], strides = [1, 1]} : vector<16x96xbf16> to vector<16x16xbf16>
    %204 = vector.shape_cast %202 : vector<16x16xbf16> to vector<1x16x16xbf16>
    %205 = vector.shape_cast %203 : vector<16x16xbf16> to vector<1x16x16xbf16>
    %206 = tpu.concatenate %204, %205 in 0 : vector<1x16x16xbf16>, vector<1x16x16xbf16> -> vector<2x16x16xbf16>
    "tpu.trace_start"() <{level = 10 : i32, message = "hmd,hnd->hmn"}> : () -> ()
    %cst_73 = arith.constant dense<0.000000e+00> : vector<2x16x16xf32>
    %207 = tpu.matmul %196, %201, %cst_73 {dimension_numbers = #tpu.dot_dimension_numbers<[2], [2], [1], [1], [0, 0, 0, 1, 1, 1], [0], [0]>} : vector<2x16x16xbf16>, vector<2x16x16xbf16>, vector<2x16x16xf32> -> vector<2x16x16xf32>
    "tpu.trace_stop"() : () -> ()
    %208 = vector.shape_cast %42 : vector<16x16xf32> to vector<1x16x16xf32>
    %209 = vector.broadcast %208 : vector<1x16x16xf32> to vector<2x16x16xf32>
    %210 = arith.addf %207, %209 : vector<2x16x16xf32>
    %cst_74 = arith.constant dense<0xFF800000> : vector<2x16xf32>
    %211 = vector.multi_reduction <maximumf>, %210, %cst_74 [2] : vector<2x16x16xf32> to vector<2x16xf32>
    %212 = vector.shape_cast %211 : vector<2x16xf32> to vector<2x16x1xf32>
    %213 = vector.broadcast %212 : vector<2x16x1xf32> to vector<2x16x16xf32>
    %214 = arith.subf %210, %213 : vector<2x16x16xf32>
    %215 = math.exp %214 : vector<2x16x16xf32>
    %cst_75 = arith.constant dense<0.000000e+00> : vector<2x16xf32>
    %216 = vector.multi_reduction <add>, %215, %cst_75 [2] : vector<2x16x16xf32> to vector<2x16xf32>
    %217 = vector.shape_cast %216 : vector<2x16xf32> to vector<2x16x1xf32>
    %218 = arith.truncf %215 : vector<2x16x16xf32> to vector<2x16x16xbf16>
    "tpu.trace_start"() <{level = 10 : i32, message = "hmn,hnd->hmd"}> : () -> ()
    %cst_76 = arith.constant dense<0.000000e+00> : vector<2x16x16xf32>
    %219 = tpu.matmul %218, %206, %cst_76 {dimension_numbers = #tpu.dot_dimension_numbers<[2], [1], [1], [2], [0, 0, 0, 1, 1, 2], [0], [0]>} : vector<2x16x16xbf16>, vector<2x16x16xbf16>, vector<2x16x16xf32> -> vector<2x16x16xf32>
    "tpu.trace_stop"() : () -> ()
    %220 = tpu.reciprocal %217 {approx = true} : vector<2x16x1xf32> -> vector<2x16x1xf32>
    %221 = vector.broadcast %220 : vector<2x16x1xf32> to vector<2x16x16xf32>
    %222 = arith.mulf %219, %221 : vector<2x16x16xf32>
    %223 = vector.extract_strided_slice %222 {offsets = [0, 0, 0], sizes = [1, 16, 16], strides = [1, 1, 1]} : vector<2x16x16xf32> to vector<1x16x16xf32>
    %224 = vector.shape_cast %223 : vector<1x16x16xf32> to vector<16x16xf32>
    %225 = vector.extract_strided_slice %222 {offsets = [1, 0, 0], sizes = [1, 16, 16], strides = [1, 1, 1]} : vector<2x16x16xf32> to vector<1x16x16xf32>
    %226 = vector.shape_cast %225 : vector<1x16x16xf32> to vector<16x16xf32>
    %227 = tpu.concatenate %224, %226 in 1 : vector<16x16xf32>, vector<16x16xf32> -> vector<16x32xf32>
    %228 = arith.truncf %227 : vector<16x32xf32> to vector<16x32xbf16>
    %c1_77 = arith.constant 1 : index
    %c0_78 = arith.constant 0 : index
    %c0_79 = arith.constant 0 : index
    %229 = vector.load %arg5[%c1_77, %c0_78, %c0_79] : memref<2x32x32xbf16, #tpu.memory_space<vmem>>, vector<1x32x32xbf16>
    %230 = vector.shape_cast %229 : vector<1x32x32xbf16> to vector<32x32xbf16>
    %cst_80 = arith.constant dense<0.000000e+00> : vector<16x32xf32>
    %231 = tpu.matmul %228, %230, %cst_80 {dimension_numbers = #tpu.dot_dimension_numbers<[1], [0], [0], [1], [0, 0, 1, 1], [], []>} : vector<16x32xbf16>, vector<32x32xbf16>, vector<16x32xf32> -> vector<16x32xf32>
    %232 = arith.addf %160, %231 : vector<16x32xf32>
    %cst_81 = arith.constant dense<0.000000e+00> : vector<16xf32>
    %233 = vector.multi_reduction <add>, %232, %cst_81 [1] : vector<16x32xf32> to vector<16xf32>
    %234 = vector.shape_cast %233 : vector<16xf32> to vector<16x1xf32>
    %cst_82 = arith.constant 3.200000e+01 : f32
    %235 = vector.broadcast %cst_82 : f32 to vector<16x1xf32>
    %236 = arith.divf %234, %235 : vector<16x1xf32>
    %237 = vector.broadcast %236 : vector<16x1xf32> to vector<16x32xf32>
    %238 = arith.subf %232, %237 : vector<16x32xf32>
    %239 = arith.mulf %238, %238 : vector<16x32xf32>
    %cst_83 = arith.constant dense<0.000000e+00> : vector<16xf32>
    %240 = vector.multi_reduction <add>, %239, %cst_83 [1] : vector<16x32xf32> to vector<16xf32>
    %241 = vector.shape_cast %240 : vector<16xf32> to vector<16x1xf32>
    %cst_84 = arith.constant 3.200000e+01 : f32
    %242 = vector.broadcast %cst_84 : f32 to vector<16x1xf32>
    %243 = arith.divf %241, %242 : vector<16x1xf32>
    %cst_85 = arith.constant 9.99999974E-6 : f32
    %244 = vector.broadcast %cst_85 : f32 to vector<16x1xf32>
    %245 = arith.addf %243, %244 : vector<16x1xf32>
    %246 = math.rsqrt %245 : vector<16x1xf32>
    %247 = vector.broadcast %246 : vector<16x1xf32> to vector<16x32xf32>
    %248 = arith.mulf %238, %247 : vector<16x32xf32>
    %249 = vector.broadcast %163 : vector<1x32xf32> to vector<16x32xf32>
    %250 = arith.mulf %248, %249 : vector<16x32xf32>
    %251 = vector.broadcast %164 : vector<1x32xf32> to vector<16x32xf32>
    %252 = arith.addf %250, %251 : vector<16x32xf32>
    %253 = arith.truncf %252 : vector<16x32xf32> to vector<16x32xbf16>
    %c1_86 = arith.constant 1 : index
    %c0_87 = arith.constant 0 : index
    %c0_88 = arith.constant 0 : index
    %254 = vector.load %arg6[%c1_86, %c0_87, %c0_88] : memref<2x32x128xbf16, #tpu.memory_space<vmem>>, vector<1x32x128xbf16>
    %255 = vector.shape_cast %254 : vector<1x32x128xbf16> to vector<32x128xbf16>
    %cst_89 = arith.constant dense<0.000000e+00> : vector<16x128xf32>
    %256 = tpu.matmul %253, %255, %cst_89 {dimension_numbers = #tpu.dot_dimension_numbers<[1], [0], [0], [1], [0, 0, 1, 1], [], []>} : vector<16x32xbf16>, vector<32x128xbf16>, vector<16x128xf32> -> vector<16x128xf32>
    %257 = vector.broadcast %165 : vector<1x128xf32> to vector<16x128xf32>
    %258 = arith.addf %256, %257 : vector<16x128xf32>
    %259 = arith.mulf %258, %258 : vector<16x128xf32>
    %260 = arith.mulf %258, %259 : vector<16x128xf32>
    %cst_90 = arith.constant 4.471500e-02 : f32
    %261 = vector.broadcast %cst_90 : f32 to vector<16x128xf32>
    %262 = arith.mulf %261, %260 : vector<16x128xf32>
    %263 = arith.addf %258, %262 : vector<16x128xf32>
    %cst_91 = arith.constant 0.797884583 : f32
    %264 = vector.broadcast %cst_91 : f32 to vector<16x128xf32>
    %265 = arith.mulf %264, %263 : vector<16x128xf32>
    %266 = math.tanh %265 : vector<16x128xf32>
    %cst_92 = arith.constant 1.000000e+00 : f32
    %267 = vector.broadcast %cst_92 : f32 to vector<16x128xf32>
    %268 = arith.addf %267, %266 : vector<16x128xf32>
    %cst_93 = arith.constant 5.000000e-01 : f32
    %269 = vector.broadcast %cst_93 : f32 to vector<16x128xf32>
    %270 = arith.mulf %269, %268 : vector<16x128xf32>
    %271 = arith.mulf %258, %270 : vector<16x128xf32>
    %272 = arith.truncf %271 : vector<16x128xf32> to vector<16x128xbf16>
    %c1_94 = arith.constant 1 : index
    %c0_95 = arith.constant 0 : index
    %c0_96 = arith.constant 0 : index
    %273 = vector.load %arg7[%c1_94, %c0_95, %c0_96] : memref<2x128x32xbf16, #tpu.memory_space<vmem>>, vector<1x128x32xbf16>
    %274 = vector.shape_cast %273 : vector<1x128x32xbf16> to vector<128x32xbf16>
    %cst_97 = arith.constant dense<0.000000e+00> : vector<16x32xf32>
    %275 = tpu.matmul %272, %274, %cst_97 {dimension_numbers = #tpu.dot_dimension_numbers<[1], [0], [0], [1], [0, 0, 1, 1], [], []>} : vector<16x128xbf16>, vector<128x32xbf16>, vector<16x32xf32> -> vector<16x32xf32>
    %276 = arith.addf %232, %275 : vector<16x32xf32>
    %277 = vector.broadcast %166 : vector<1x32xf32> to vector<16x32xf32>
    %278 = arith.addf %276, %277 : vector<16x32xf32>
    %cst_98 = arith.constant dense<0.000000e+00> : vector<16xf32>
    %279 = vector.multi_reduction <add>, %278, %cst_98 [1] : vector<16x32xf32> to vector<16xf32>
    %280 = vector.shape_cast %279 : vector<16xf32> to vector<16x1xf32>
    %cst_99 = arith.constant 3.200000e+01 : f32
    %281 = vector.broadcast %cst_99 : f32 to vector<16x1xf32>
    %282 = arith.divf %280, %281 : vector<16x1xf32>
    %283 = vector.broadcast %282 : vector<16x1xf32> to vector<16x32xf32>
    %284 = arith.subf %278, %283 : vector<16x32xf32>
    %285 = arith.mulf %284, %284 : vector<16x32xf32>
    %cst_100 = arith.constant dense<0.000000e+00> : vector<16xf32>
    %286 = vector.multi_reduction <add>, %285, %cst_100 [1] : vector<16x32xf32> to vector<16xf32>
    %287 = vector.shape_cast %286 : vector<16xf32> to vector<16x1xf32>
    %cst_101 = arith.constant 3.200000e+01 : f32
    %288 = vector.broadcast %cst_101 : f32 to vector<16x1xf32>
    %289 = arith.divf %287, %288 : vector<16x1xf32>
    %cst_102 = arith.constant 9.99999974E-6 : f32
    %290 = vector.broadcast %cst_102 : f32 to vector<16x1xf32>
    %291 = arith.addf %289, %290 : vector<16x1xf32>
    %292 = math.rsqrt %291 : vector<16x1xf32>
    %293 = vector.broadcast %292 : vector<16x1xf32> to vector<16x32xf32>
    %294 = arith.mulf %284, %293 : vector<16x32xf32>
    %295 = vector.broadcast %2 : vector<1x32xf32> to vector<16x32xf32>
    %296 = arith.mulf %294, %295 : vector<16x32xf32>
    %297 = vector.broadcast %3 : vector<1x32xf32> to vector<16x32xf32>
    %298 = arith.addf %296, %297 : vector<16x32xf32>
    %299 = arith.truncf %298 : vector<16x32xf32> to vector<16x32xbf16>
    %c0_103 = arith.constant 0 : index
    %c0_104 = arith.constant 0 : index
    %300 = vector.load %arg8[%c0_103, %c0_104] : memref<32x128xbf16, #tpu.memory_space<vmem>>, vector<32x128xbf16>
    %cst_105 = arith.constant dense<0.000000e+00> : vector<16x128xf32>
    %301 = tpu.matmul %299, %300, %cst_105 {dimension_numbers = #tpu.dot_dimension_numbers<[1], [0], [0], [1], [0, 0, 1, 1], [], []>} : vector<16x32xbf16>, vector<32x128xbf16>, vector<16x128xf32> -> vector<16x128xf32>
    %302 = vector.broadcast %4 : vector<1x128xf32> to vector<16x128xf32>
    %303 = arith.addf %301, %302 : vector<16x128xf32>
    %cst_106 = arith.constant 0.000000e+00 : f32
    %304 = vector.broadcast %cst_106 : f32 to vector<16x96xf32>
    %305 = tpu.concatenate %303, %298, %304 in 1 : vector<16x128xf32>, vector<16x32xf32>, vector<16x96xf32> -> vector<16x256xf32>
    %c0_107 = arith.constant 0 : index
    %c0_108 = arith.constant 0 : index
    %306 = vector.load %arg9[%c0_107, %c0_108] : memref<16x256xf32, #tpu.memory_space<vmem>>, vector<16x256xf32>
    tpu.vector_store %arg9[%c0_107, %c0_108], %305 {strides = array<i32>} : memref<16x256xf32, #tpu.memory_space<vmem>>, vector<16x256xf32>,
    return
  }
  func.func @transform_0(%arg0: i32) -> (i32, i32) {
    %c0_i32 = arith.constant 0 : i32
    %c0_i32_0 = arith.constant 0 : i32
    %c0_i32_1 = arith.constant 0 : i32
    return %c0_i32, %c0_i32_0 : i32, i32
  }
  func.func @transform_1(%arg0: i32) -> (i32, i32) {
    %c0_i32 = arith.constant 0 : i32
    %c0_i32_0 = arith.constant 0 : i32
    %c0_i32_1 = arith.constant 0 : i32
    return %c0_i32, %c0_i32_0 : i32, i32
  }
  func.func @transform_2(%arg0: i32) -> (i32, i32) {
    %c0_i32 = arith.constant 0 : i32
    %c0_i32_0 = arith.constant 0 : i32
    %c0_i32_1 = arith.constant 0 : i32
    return %c0_i32, %c0_i32_0 : i32, i32
  }
  func.func @transform_3(%arg0: i32) -> (i32, i32, i32) {
    %c0_i32 = arith.constant 0 : i32
    %c0_i32_0 = arith.constant 0 : i32
    %c0_i32_1 = arith.constant 0 : i32
    %c0_i32_2 = arith.constant 0 : i32
    return %c0_i32, %c0_i32_0, %c0_i32_1 : i32, i32, i32
  }
  func.func @transform_4(%arg0: i32) -> (i32, i32, i32) {
    %c0_i32 = arith.constant 0 : i32
    %c0_i32_0 = arith.constant 0 : i32
    %c0_i32_1 = arith.constant 0 : i32
    %c0_i32_2 = arith.constant 0 : i32
    return %c0_i32, %c0_i32_0, %c0_i32_1 : i32, i32, i32
  }
  func.func @transform_5(%arg0: i32) -> (i32, i32, i32) {
    %c0_i32 = arith.constant 0 : i32
    %c0_i32_0 = arith.constant 0 : i32
    %c0_i32_1 = arith.constant 0 : i32
    %c0_i32_2 = arith.constant 0 : i32
    return %c0_i32, %c0_i32_0, %c0_i32_1 : i32, i32, i32
  }
  func.func @transform_6(%arg0: i32) -> (i32, i32, i32) {
    %c0_i32 = arith.constant 0 : i32
    %c0_i32_0 = arith.constant 0 : i32
    %c0_i32_1 = arith.constant 0 : i32
    %c0_i32_2 = arith.constant 0 : i32
    return %c0_i32, %c0_i32_0, %c0_i32_1 : i32, i32, i32
  }
  func.func @transform_7(%arg0: i32) -> (i32, i32) {
    %c0_i32 = arith.constant 0 : i32
    %c0_i32_0 = arith.constant 0 : i32
    %c0_i32_1 = arith.constant 0 : i32
    return %c0_i32, %c0_i32_0 : i32, i32
  }
  func.func @transform_8(%arg0: i32) -> (i32, i32) {
    %c0_i32 = arith.constant 0 : i32
    %c0_i32_0 = arith.constant 0 : i32
    %c0_i32_1 = arith.constant 0 : i32
    return %c0_i32, %c0_i32_0 : i32, i32
  }
}

</mosaic_0001>

<bundles_post_ra>
// kernel: tpu_custom_call.1
= control target key start
LH: loop header
LB: loop body
LE: loop exit
PB: predicated region body
PF: predicated region fallthrough
CT: control target
= control target key end

     0   :  { %vm38_vm0 = vcmask 261120   ;;  %s1942_s0 = inlined_call_operand.vmem [shape: f32[16,32], index: 0, kind: input, shape index: {}]   ;;  %s1943_s1 = inlined_call_operand.vmem [shape: f32[2,16], index: 1, kind: input, shape index: {}]   ;;  %s1944_s2 = inlined_call_operand.vmem [shape: f32[17,128], index: 2, kind: input, shape index: {}]   ;;  %s1945_s3 = inlined_call_operand.vmem [shape: bf16[2,32,96], index: 3, kind: input, shape index: {}]   ;;  %s1946_s4 = inlined_call_operand.vmem [shape: bf16[2,32,32], index: 4, kind: input, shape index: {}]   ;;  %s1947_s5 = inlined_call_operand.vmem [shape: bf16[2,32,128], index: 5, kind: input, shape index: {}]   ;;  %s1948_s6 = inlined_call_operand.vmem [shape: bf16[2,128,32], index: 6, kind: input, shape index: {}]   ;;  %s1949_s7 = inlined_call_operand.vmem [shape: bf16[32,128], index: 7, kind: input, shape index: {}]   ;;  %s1950_s8 = inlined_call_operand.hbm [shape: f32[16,256], index: 8, kind: output, shape index: {}]  }
   0x1   :  { %v36_v0 = vld [vmem:[%s1942_s0] sm:$0xff]  ;;  %v37_v2 = vld [vmem:[%s1942_s0 + $0x8] sm:$0xff] }
   0x2   :  { %v39_v1 = vsel %vm38_vm0, %v36_v0, 0.0  ;;  %v42_v3 = vsel %vm38_vm0, %v37_v2, 0.0 }
   0x3   :  { %40 = vadd.xlane.f32.xlu0 %v39_v1 }
   0x4   :  { %13 = vsyncpa [#allocation3], 0  ;;  %v1558_v4 = vmov 32.0   ;;  %v1448_v35 = vld [vmem:[%s1944_s2] ss:$0 sm:$0xff]  ;;  %v1396_v61 = vld [vmem:[%s1945_s3 + $0x8] sm:$0xff] }
   0x5   :  { %1466 = vrcp.f32 %v1558_v4  ;;  %v1449_v39 = vld [vmem:[%s1944_s2 + $0x1] ss:$0 sm:$0xff]  ;;  %242 = vmatpush.bf16.msra.mxu0 %v1396_v61  ;;  %s1559_s20 = smov 112   ;;  %s1560_s21 = smov 96   ;;  %vm263_vm14 = vcmask 130048  }
   0x6   :  { %v1395_v63 = vld [vmem:[%s1945_s3] sm:$0xff]  ;;  %s1562_s24 = smov 64   ;;  %s1564_s30 = smov 16  }
   0x7   :  { %s1565_s14 = smov [#allocation2]   ;;  %s1220_s18 = sshll.u32 %s1950_s8, 4  ;;  %s1221_s18 = int_to_ptr.hbm [resolvable:$true] %s1220_s18 }
   0x8   :  { %s1218_s15 = sshll.u32 %s1565_s14, 4  ;;  %s1566_s19 = smov 256   ;;  %s1219_s15 = int_to_ptr.vmem [resolvable:$true] %s1218_s15 }
   0x9   :  { %243 = vmatpush.bf16.msra.mxu0 %v1395_v63  ;;  %v1563_v63 = vmov -1e+09  }
   0xb   :  { %43 = vadd.xlane.f32.xlu0 %v42_v3  ;;  %v1467_v5 = vpop.eup %1466 }
   0xc   :  { %v46_v6 = vmul.f32 32.0, %v1467_v5  ;;  %vm50_vm1 = vweird.f32 %v1467_v5 }
   0xe   :  { %v47_v7 = vsub.f32 1.0, %v46_v6 }
  0x10   :  { %v48_v8 = vmul.f32 %v1467_v5, %v47_v7 }
  0x12   :  { %v49_v9 = vadd.f32 %v1467_v5, %v48_v8 }
  0x14   :  { %v1620_v10 = vsel %vm50_vm1, %v1467_v5, %v49_v9 }
  0x76   :  { %v41_v11 = vpop.xlane.xlu0 %40 }
  0x77   :  { %v52_v12 = vmul.f32 %v1620_v10, %v41_v11 }
  0x79   :  { %v54_v13 = vsub.f32 %v36_v0, %v52_v12 }
  0x7b   :  { %v56_v14 = vmul.f32 %v54_v13, %v54_v13 }
  0x7d   :  { %v58_v15 = vsel %vm38_vm0, %v56_v14, 0.0 }
  0x7e   :  { %59 = vadd.xlane.f32.xlu1 %v58_v15  ;;  %v44_v16 = vpop.xlane.xlu0 %43 }
  0x7f   :  { %v53_v17 = vmul.f32 %v1620_v10, %v44_v16 }
  0x81   :  { %v55_v18 = vsub.f32 %v37_v2, %v53_v17 }
  0x83   :  { %v57_v19 = vmul.f32 %v55_v18, %v55_v18 }
  0x85   :  { %v61_v20 = vsel %vm38_vm0, %v57_v19, 0.0  ;;  %v1450_v19 = vld [vmem:[%s1944_s2 + $0x2] ss:$0 sm:$0xff] }
  0x86   :  { %62 = vadd.xlane.f32.xlu1 %v61_v20 }
  0xf1   :  { %v60_v21 = vpop.xlane.xlu1 %59 }
  0xf2   :  { %v64_v22 = vmul.f32 %v60_v21, %v1620_v10 }
  0xf4   :  { %v66_v23 = vadd.f32 1e-05, %v64_v22 }
  0xf6   :  { %1468 = vrsqrt.f32 %v66_v23  ;;  %vm74_vm3 = vweird.f32 %v66_v23 }
  0xf9   :  { %v63_v24 = vpop.xlane.xlu1 %62 }
  0xfa   :  { %v65_v25 = vmul.f32 %v63_v24, %v1620_v10  ;;  %v1451_v24 = vld [vmem:[%s1944_s2 + $0x3] ss:$0 sm:$0xff] }
  0xfc   :  { %v1469_v26 = vpop.eup %1468  ;;  %v67_v27 = vadd.f32 1e-05, %v65_v25 }
  0xfd   :  { %v69_v28 = vmul.f32 %v1469_v26, %v66_v23  ;;  %vm75_vm2 = vweird.f32 %v1469_v26 }
  0xfe   :  { %1470 = vrsqrt.f32 %v67_v27  ;;  %vm76_vm4 = vmor %vm74_vm3, %vm75_vm2  ;;  %vm84_vm6 = vweird.f32 %v67_v27 }
  0xff   :  { %v70_v29 = vmul.f32 %v1469_v26, %v69_v28 }
 0x101   :  { %v71_v30 = vmul.f32 0.5, %v70_v29 }
 0x103   :  { %v72_v31 = vsub.f32 1.5, %v71_v30 }
 0x104   :  { %v1471_v32 = vpop.eup %1470 }
 0x105   :  { %v73_v33 = vmul.f32 %v1469_v26, %v72_v31  ;;  %v79_v34 = vmul.f32 %v1471_v32, %v67_v27  ;;  %vm85_vm5 = vweird.f32 %v1471_v32 }
 0x106   :  { %vm86_vm7 = vmor %vm84_vm6, %vm85_vm5 }
 0x107   :  { %v77_v36 = vsel %vm76_vm4, %v1469_v26, %v73_v33  ;;  %v80_v37 = vmul.f32 %v1471_v32, %v79_v34 }
 0x108   :  { %v88_v38 = vmul.f32 %v77_v36, %v54_v13  ;;  %v103_v36 = vld [vmem:[%s1943_s1 + $0x1] sm:$0x1] }
 0x109   :  { %v81_v40 = vmul.f32 0.5, %v80_v37 }
 0x10a   :  { %v91_v41 = vmul.f32 %v1448_v35, %v88_v38 }
 0x10b   :  { %v82_v42 = vsub.f32 1.5, %v81_v40 }
 0x10c   :  { %v1634_v43 = vadd.f32 %v1449_v39, %v91_v41 }
 0x10d   :  { %v83_v44 = vmul.f32 %v1471_v32, %v82_v42 }
 0x10e   :  { %v166_v45 = vsel %vm38_vm0, %v1634_v43, 0.0 }
 0x10f   :  { %v87_v46 = vsel %vm86_vm7, %v1471_v32, %v83_v44  ;;  %167 = vadd.xlane.f32.xlu2 %v166_v45  ;;  %v1561_v45 = vmov 0  }
 0x110   :  { %v89_v47 = vmul.f32 %v87_v46, %v55_v18  ;;  %1435 = vset.pattern.permute.xlu2 %v1561_v45  ;;  %1436 = vset.pattern.permute.xlu1 %v1561_v45 }
 0x112   :  { %v92_v48 = vmul.f32 %v1448_v35, %v89_v47 }
 0x114   :  { %v1638_v49 = vadd.f32 %v1449_v39, %v92_v48 }
 0x116   :  { %v169_v50 = vsel %vm38_vm0, %v1638_v49, 0.0 }
 0x117   :  { %170 = vadd.xlane.f32.xlu2 %v169_v50 }
 0x182   :  { %v168_v51 = vpop.xlane.xlu2 %167 }
 0x183   :  { %v172_v52 = vmul.f32 %v168_v51, %v1620_v10 }
 0x185   :  { %v174_v53 = vsub.f32 %v1634_v43, %v172_v52  ;;  %v101_v52 = vld [vmem:[%s1943_s1] sm:$0x1] }
 0x186   :  { %vm102_vm15 = vcmp.gt.f32.partialorder %v101_v52, 0.5 }
 0x187   :  { %v176_v54 = vmul.f32 %v174_v53, %v174_v53 }
 0x189   :  { %v178_v55 = vsel %vm38_vm0, %v176_v54, 0.0  ;;  %v1452_v54 = vld [vmem:[%s1943_s1 + $0x1] ss:$0 sm:$0xff] }
 0x18a   :  { %179 = vadd.xlane.f32.xlu0 %v178_v55  ;;  %v171_v56 = vpop.xlane.xlu2 %170 }
 0x18b   :  { %v173_v57 = vmul.f32 %v171_v56, %v1620_v10 }
 0x18d   :  { %v175_v58 = vsub.f32 %v1638_v49, %v173_v57  ;;  %v153_v57 = vsel %vm102_vm15, 1, %v1561_v45 }
 0x18f   :  { %v177_v59 = vmul.f32 %v175_v58, %v175_v58 }
 0x191   :  { %v181_v60 = vsel %vm38_vm0, %v177_v59, 0.0  ;;  %v154_v59 = vperm.slane %v153_v57, 0 }
 0x192   :  { %182 = vadd.xlane.f32.xlu1 %v181_v60 }
 0x193   :  { %vm1685_vm3 = vcmp.eq.s32.totalorder %v154_v59, 1 }
 0x1fd   :  { %v180_v62 = vpop.xlane.xlu0 %179 }
 0x1fe   :  { %v184_v0 = vmul.f32 %v180_v62, %v1620_v10 }
 0x200   :  { %v186_v1 = vadd.f32 1e-05, %v184_v0 }
 0x202   :  { %1472 = vrsqrt.f32 %v186_v1  ;;  %vm194_vm9 = vweird.f32 %v186_v1 }
 0x205   :  { %v183_v2 = vpop.xlane.xlu1 %182 }
 0x206   :  { %v185_v3 = vmul.f32 %v183_v2, %v1620_v10 }
 0x208   :  { %v1473_v4 = vpop.eup %1472  ;;  %v187_v5 = vadd.f32 1e-05, %v185_v3 }
 0x209   :  { %v189_v6 = vmul.f32 %v1473_v4, %v186_v1  ;;  %vm195_vm8 = vweird.f32 %v1473_v4 }
 0x20a   :  { %1474 = vrsqrt.f32 %v187_v5  ;;  %vm196_vm10 = vmor %vm194_vm9, %vm195_vm8  ;;  %vm204_vm12 = vweird.f32 %v187_v5 }
 0x20b   :  { %v190_v7 = vmul.f32 %v1473_v4, %v189_v6 }
 0x20d   :  { %v191_v8 = vmul.f32 0.5, %v190_v7 }
 0x20f   :  { %v192_v9 = vsub.f32 1.5, %v191_v8 }
 0x210   :  { %v1475_v11 = vpop.eup %1474 }
 0x211   :  { %v193_v12 = vmul.f32 %v1473_v4, %v192_v9  ;;  %v199_v13 = vmul.f32 %v1475_v11, %v187_v5  ;;  %vm205_vm11 = vweird.f32 %v1475_v11 }
 0x212   :  { %vm206_vm13 = vmor %vm204_vm12, %vm205_vm11 }
 0x213   :  { %v200_v14 = vmul.f32 %v1475_v11, %v199_v13  ;;  %v197_v15 = vsel %vm196_vm10, %v1473_v4, %v193_v12 }
 0x214   :  { %v208_v18 = vmul.f32 %v197_v15, %v174_v53  ;;  %v96_v53 = vlaneseq }
 0x215   :  { %v201_v16 = vmul.f32 0.5, %v200_v14 }
 0x216   :  { %v211_v23 = vmul.f32 %v1450_v19, %v208_v18  ;;  %v97_v55 = vshrl.u32 %v96_v53, 7  ;;  %v100_v56 = vand.u32 127, %v96_v53 }
 0x217   :  { %v202_v17 = vsub.f32 1.5, %v201_v16 }
 0x218   :  { %v214_v26 = vadd.f32 %v1451_v24, %v211_v23  ;;  %vm149_vm1 = vcmp.le.s32.totalorder %v100_v56, %v97_v55  ;;  %v98_v61 = vadd.s32 8, %v97_v55 }
 0x219   :  { %v203_v20 = vmul.f32 %v1475_v11, %v202_v17 }
 0x21a   :  { %vm150_vm6 = vcmp.le.s32.totalorder %v100_v56, %v98_v61 }
 0x21b   :  { %v207_v21 = vsel %vm206_vm13, %v1475_v11, %v203_v20 }
 0x21c   :  { %v209_v22 = vmul.f32 %v207_v21, %v175_v58 }
 0x21e   :  { %v212_v25 = vmul.f32 %v1450_v19, %v209_v22 }
 0x220   :  { %v215_v27 = vadd.f32 %v1451_v24, %v212_v25 }
 0x222   :  { %v216_v28 = vpack.c.bf16 %v215_v27, %v214_v26 }
 0x224   :  { %1240 = vmatmul.msk.bf16.vlgmr.msra.gmra.mxu0 %vm38_vm0, %v216_v28 }
 0x2a1   :  { %v245_v29 = vpop.f32.mrf.mxu0 }
 0x2a2   :  { %v250_v30 = vpack.c.bf16 %v245_v29, %v245_v29 }
 0x2a4   :  { %254 = vrot.lane.b32.xlu2 %v250_v30, %s1559_s20  ;;  %v258_v33 = vunpack.c.l.b16 %v250_v30 }
 0x2a9   :  { %v247_v31 = vpop.f32.mrf.mxu0 }
 0x2aa   :  { %v251_v32 = vpack.c.bf16 %v247_v31, %v247_v31 }
 0x2ac   :  { %v259_v34 = vunpack.c.l.b16 %v251_v32  ;;  %256 = vrot.lane.b32.xlu0 %v251_v32, %s1559_s20 }
 0x2ae   :  { %v1665_v35 = vpack.c.b16 %v259_v34, %v258_v33 }
 0x2b0   :  { %261 = vrot.lane.b32.xlu2 %v1665_v35, %s1560_s21 }
 0x2ce   :  { %104 = vxpose.xlu0.b32.start.end [1/1] (short) (narrow) %v103_v36, 16 }
 0x2fe   :  { %v255_v37 = vpop.permute.xlu2 %254 }
 0x2ff   :  { %v284_v41 = vunpack.c.l.b16 %v255_v37 }
 0x30a   :  { %v262_v38 = vpop.permute.xlu2 %261 }
 0x30b   :  { %v268_v39 = vsel %vm263_vm14, %v262_v38, 0 }
 0x30c   :  { %277 = vmatpush.bf16.xpose.msra.mxu1 %v268_v39 }
 0x313   :  { %1241 = vmatmul.msk.bf16.vlgmr.msra.gmra.mxu1 %vm263_vm14, %v1665_v35 }
 0x31e   :  { %v257_v40 = vpop.permute.xlu0 %256 }
 0x31f   :  { %v285_v42 = vunpack.c.l.b16 %v257_v40 }
 0x321   :  { %v286_v44 = vpack.c.b16 %v285_v42, %v284_v41 }
 0x323   :  { %287 = vrot.lane.b32.xlu1 %v286_v44, %s1560_s21 }
 0x335   :  { %1447 = vset.pattern.permute.xlu0 %v1561_v45 }
 0x344   :  { %379 = vrot.lane.b32.xlu0 %v286_v44, %s1562_s24 }
 0x372   :  { %v120_v46 = vpop.trf.xlu0 }
 0x373   :  { %138 = vperm.xlu2 %1435, %v120_v46  }
 0x37a   :  { %v121_v47 = vpop.trf.xlu0 }
 0x37b   :  { %143 = vperm.xlu1 %1436, %v121_v47   ;;  %v1398_v47 = vld [vmem:[%s1946_s4 + $0x8] sm:$0xff] }
 0x37c   :  { %443 = vmatpush.bf16.msrb.mxu0 %v1398_v47  ;;  %v1453_v47 = vld [vmem:[%s1944_s2 + $0x4] ss:$0 sm:$0xff] }
 0x390   :  { %v279_v4 = vpop.f32.mrf.mxu1 }
 0x395   :  { %v288_v48 = vpop.permute.xlu1 %287 }
 0x396   :  { %v293_v50 = vsel %vm263_vm14, %v288_v48, 0 }
 0x397   :  { %302 = vmatpush.bf16.xpose.msra.mxu2 %v293_v50 }
 0x398   :  { %v281_v12 = vpop.f32.mrf.mxu1 }
 0x39e   :  { %1242 = vmatmul.msk.bf16.vlgmr.msra.gmra.mxu2 %vm263_vm14, %v286_v44 }
 0x3b6   :  { %v380_v51 = vpop.permute.xlu0 %379 }
 0x3b7   :  { %392 = vmatpush.bf16.msra.mxu3 %v380_v51 }
 0x3cd   :  { %v139_v58 = vpop.permute.xlu2 %138 }
 0x3ce   :  { %vm147_vm2 = vcmp.eq.f32.partialorder %v139_v58, %v1452_v54  ;;  %v1397_v58 = vld [vmem:[%s1946_s4] sm:$0xff] }
 0x3cf   :  { %vm151_vm4 = vmand %vm147_vm2, %vm149_vm1  ;;  %444 = vmatpush.bf16.msrb.mxu0 %v1397_v58 }
 0x3d0   :  { %vm156_vm5 = vmand %vm151_vm4, %vm1685_vm3 }
 0x3d1   :  { %v1691_v0 = vsel %vm156_vm5, 0.0, %v1563_v63 }
 0x3d2   :  { %v280_v5 = vadd.f32 %v279_v4, %v1691_v0 }
 0x3d4   :  { %v309_v11 = vsel %vm263_vm14, %v280_v5, -inf }
 0x3ed   :  { %v144_v62 = vpop.permute.xlu1 %143 }
 0x3ee   :  { %vm148_vm7 = vcmp.eq.f32.partialorder %v144_v62, %v1452_v54 }
 0x3ef   :  { %vm152_vm8 = vmand %vm148_vm7, %vm150_vm6 }
 0x3f0   :  { %vm157_vm9 = vmand %vm152_vm8, %vm1685_vm3 }
 0x3f1   :  { %v1698_v6 = vsel %vm157_vm9, 0.0, %v1563_v63 }
 0x3f2   :  { %v282_v13 = vadd.f32 %v281_v12, %v1698_v6 }
 0x3f4   :  { %v312_v14 = vsel %vm263_vm14, %v282_v13, -inf }
 0x421   :  { %v304_v1 = vpop.f32.mrf.mxu2 }
 0x422   :  { %v305_v2 = vadd.f32 %v304_v1, %v1691_v0 }
 0x424   :  { %v315_v3 = vsel %vm263_vm14, %v305_v2, -inf }
 0x425   :  { %316 = vmax.xlane.f32.xlu2 %v315_v3 }
 0x429   :  { %v306_v7 = vpop.f32.mrf.mxu2 }
 0x42a   :  { %v307_v8 = vadd.f32 %v306_v7, %v1698_v6 }
 0x42c   :  { %v318_v9 = vsel %vm263_vm14, %v307_v8, -inf }
 0x42d   :  { %319 = vmax.xlane.f32.xlu1 %v318_v9  ;;  %310 = vmax.xlane.f32.xlu2 %v309_v11 }
 0x435   :  { %313 = vmax.xlane.f32.xlu1 %v312_v14 }
 0x445   :  { %354 = vrot.lane.b32.xlu2 %v1665_v35, %s1562_s24 }
 0x498   :  { %v317_v15 = vpop.xlane.xlu2 %316 }
 0x499   :  { %v323_v16 = vsub.f32 %v305_v2, %v317_v15 }
 0x49b   :  { %v329_v17 = vmul.f32 1.442695, %v323_v16 }
 0x49d   :  { %1476 = vpow2.f32 %v329_v17 }
 0x4a0   :  { %v320_v18 = vpop.xlane.xlu1 %319  ;;  %v311_v19 = vpop.xlane.xlu2 %310 }
 0x4a1   :  { %v324_v20 = vsub.f32 %v307_v8, %v320_v18  ;;  %v321_v21 = vsub.f32 %v280_v5, %v311_v19 }
 0x4a3   :  { %v1477_v22 = vpop.eup %1476  ;;  %v331_v23 = vmul.f32 1.442695, %v324_v20  ;;  %v325_v25 = vmul.f32 1.442695, %v321_v21 }
 0x4a4   :  { %v339_v24 = vsel %vm263_vm14, %v1477_v22, 0.0  ;;  %v347_v29 = vpack.c.bf16 %v1477_v22, %v1477_v22 }
 0x4a5   :  { %1478 = vpow2.f32 %v331_v23  ;;  %340 = vadd.xlane.f32.xlu1 %v339_v24 }
 0x4a6   :  { %1480 = vpow2.f32 %v325_v25  ;;  %v376_v34 = vunpack.c.l.b16 %v347_v29 }
 0x4a8   :  { %v314_v26 = vpop.xlane.xlu1 %313  ;;  %v355_v27 = vpop.permute.xlu2 %354 }
 0x4a9   :  { %v322_v28 = vsub.f32 %v282_v13, %v314_v26  ;;  %367 = vmatpush.bf16.msrb.mxu1 %v355_v27  ;;  %v1400_v26 = vld [vmem:[%s1947_s5 + $0x8] sm:$0xff] }
 0x4ab   :  { %v1479_v30 = vpop.eup %1478  ;;  %v327_v31 = vmul.f32 1.442695, %v322_v28 }
 0x4ac   :  { %v342_v32 = vsel %vm263_vm14, %v1479_v30, 0.0  ;;  %v348_v33 = vpack.c.bf16 %v1479_v30, %v1479_v30  ;;  %v1481_v36 = vpop.eup %1480  ;;  %v1399_v30 = vld [vmem:[%s1947_s5] sm:$0xff] }
 0x4ad   :  { %1482 = vpow2.f32 %v327_v31  ;;  %343 = vadd.xlane.f32.xlu1 %v342_v32  ;;  %v345_v38 = vpack.c.bf16 %v1481_v36, %v1481_v36  ;;  %v333_v42 = vsel %vm263_vm14, %v1481_v36, 0.0  ;;  %530 = vmatpush.bf16.msra.mxu1 %v1400_v26 }
 0x4ae   :  { %v377_v35 = vunpack.c.l.b16 %v348_v33 }
 0x4af   :  { %v351_v44 = vunpack.c.l.b16 %v345_v38 }
 0x4b0   :  { %v378_v37 = vpack.c.b16 %v377_v35, %v376_v34 }
 0x4b1   :  { %531 = vmatpush.bf16.msra.mxu1 %v1399_v30  ;;  %v1456_v30 = vld [vmem:[%s1944_s2 + $0x7] ss:$0 sm:$0xff] }
 0x4b2   :  { %1244 = vmatmul.msk.bf16.vlgmr.msra.gmra.mxu3 %vm263_vm14, %v378_v37 }
 0x4b3   :  { %v1483_v39 = vpop.eup %1482 }
 0x4b4   :  { %v346_v40 = vpack.c.bf16 %v1483_v39, %v1483_v39  ;;  %v336_v41 = vsel %vm263_vm14, %v1483_v39, 0.0 }
 0x4b5   :  { %337 = vadd.xlane.f32.xlu2 %v336_v41  ;;  %334 = vadd.xlane.f32.xlu1 %v333_v42 }
 0x4b6   :  { %v352_v45 = vunpack.c.l.b16 %v346_v40 }
 0x4b8   :  { %v353_v46 = vpack.c.b16 %v352_v45, %v351_v44 }
 0x4ba   :  { %1243 = vmatmul.msk.bf16.vlgmr.msrb.gmra.mxu1 %vm263_vm14, %v353_v46 }
 0x518   :  { %v341_v48 = vpop.xlane.xlu1 %340 }
 0x519   :  { %1484 = vrcp.f32 %v341_v48 }
 0x51f   :  { %v1485_v52 = vpop.eup %1484 }
 0x520   :  { %v344_v50 = vpop.xlane.xlu1 %343 }
 0x521   :  { %1486 = vrcp.f32 %v344_v50 }
 0x527   :  { %v1487_v53 = vpop.eup %1486 }
 0x528   :  { %v335_v60 = vpop.xlane.xlu1 %334  ;;  %v338_v61 = vpop.xlane.xlu2 %337 }
 0x529   :  { %1488 = vrcp.f32 %v335_v60  ;;  %v1407_v60 = vld [vmem:[%s1948_s6 + $0x30] sm:$0xff] }
 0x52a   :  { %1490 = vrcp.f32 %v338_v61  ;;  %v1406_v61 = vld [vmem:[%s1948_s6 + $0x28] sm:$0xff] }
 0x52f   :  { %v1489_v63 = vpop.eup %1488 }
 0x530   :  { %v1491_v1 = vpop.eup %1490 }
 0x535   :  { %v394_v51 = vpop.f32.mrf.mxu3 }
 0x536   :  { %v405_v55 = vmul.f32 %v1485_v52, %v394_v51  ;;  %v1454_v52 = vld [vmem:[%s1944_s2 + $0x5] ss:$0 sm:$0xff] }
 0x537   :  { %v369_v59 = vpop.f32.mrf.mxu1 }
 0x538   :  { %v403_v3 = vmul.f32 %v1489_v63, %v369_v59  ;;  %v1408_v59 = vld [vmem:[%s1948_s6 + $0x38] sm:$0xff] }
 0x539   :  { %621 = vmatpush.bf16.msrb.mxu2 %v1408_v59  ;;  %v1404_v63 = vld [vmem:[%s1948_s6 + $0x18] sm:$0xff] }
 0x53d   :  { %v396_v54 = vpop.f32.mrf.mxu3  ;;  %622 = vmatpush.bf16.msrb.mxu2 %v1407_v60 }
 0x53e   :  { %v406_v56 = vmul.f32 %v1487_v53, %v396_v54 }
 0x53f   :  { %v371_v62 = vpop.f32.mrf.mxu1 }
 0x540   :  { %v1437_v57 = vpack.i.bf16 %v406_v56, %v405_v55  ;;  %v404_v4 = vmul.f32 %v1491_v1, %v371_v62  ;;  %v1405_v62 = vld [vmem:[%s1948_s6 + $0x20] sm:$0xff]  ;;  %v1403_v1 = vld [vmem:[%s1948_s6 + $0x10] sm:$0xff] }
 0x541   :  { %623 = vmatpush.bf16.msrb.mxu2 %v1406_v61 }
 0x542   :  { %1438 = vrot.lane.b32.xlu1 %v1437_v57, %s1564_s30 }
 0x545   :  { %624 = vmatpush.bf16.msrb.mxu2 %v1405_v62 }
 0x549   :  { %625 = vmatpush.bf16.msrb.mxu2 %v1404_v63 }
 0x54d   :  { %626 = vmatpush.bf16.msrb.mxu2 %v1403_v1 }
 0x5b4   :  { %v1439_v2 = vpop.permute.xlu1 %1438 }
 0x5b5   :  { %v1441_v5 = vunpack.i.h.bf16 %v1439_v2  ;;  %v1440_v7 = vunpack.i.l.bf16 %v1439_v2  ;;  %v1402_v2 = vld [vmem:[%s1948_s6 + $0x8] sm:$0xff] }
 0x5b6   :  { %627 = vmatpush.bf16.msrb.mxu2 %v1402_v2 }
 0x5b7   :  { %v415_v8 = vsel %vm263_vm14, %v403_v3, %v1440_v7  ;;  %v416_v9 = vsel %vm263_vm14, %v404_v4, %v1441_v5  ;;  %v1455_v3 = vld [vmem:[%s1944_s2 + $0x6] ss:$0 sm:$0xff] }
 0x5b8   :  { %v417_v11 = vpack.c.bf16 %v416_v9, %v415_v8  ;;  %v1401_v4 = vld [vmem:[%s1948_s6] sm:$0xff] }
 0x5ba   :  { %1253 = vmatmul.msk.bf16.vlgmr.msrb.gmra.mxu0 %vm38_vm0, %v417_v11  ;;  %628 = vmatpush.bf16.msrb.mxu2 %v1401_v4 }
 0x637   :  { %v446_v12 = vpop.f32.mrf.mxu0 }
 0x638   :  { %v1724_v13 = vadd.f32 %v446_v12, %v1634_v43 }
 0x63a   :  { %v453_v14 = vsel %vm38_vm0, %v1724_v13, 0.0 }
 0x63b   :  { %454 = vadd.xlane.f32.xlu1 %v453_v14 }
 0x63f   :  { %v448_v15 = vpop.f32.mrf.mxu0 }
 0x640   :  { %v1729_v16 = vadd.f32 %v448_v15, %v1638_v49 }
 0x642   :  { %v456_v17 = vsel %vm38_vm0, %v1729_v16, 0.0 }
 0x643   :  { %457 = vadd.xlane.f32.xlu2 %v456_v17 }
 0x6ae   :  { %v455_v18 = vpop.xlane.xlu1 %454 }
 0x6af   :  { %v459_v19 = vmul.f32 %v455_v18, %v1620_v10 }
 0x6b1   :  { %v461_v20 = vsub.f32 %v1724_v13, %v459_v19 }
 0x6b3   :  { %v463_v21 = vmul.f32 %v461_v20, %v461_v20 }
 0x6b5   :  { %v465_v43 = vsel %vm38_vm0, %v463_v21, 0.0 }
 0x6b6   :  { %466 = vadd.xlane.f32.xlu2 %v465_v43  ;;  %v458_v22 = vpop.xlane.xlu2 %457 }
 0x6b7   :  { %v460_v23 = vmul.f32 %v458_v22, %v1620_v10 }
 0x6b9   :  { %v462_v24 = vsub.f32 %v1729_v16, %v460_v23 }
 0x6bb   :  { %v464_v49 = vmul.f32 %v462_v24, %v462_v24 }
 0x6bd   :  { %v468_v25 = vsel %vm38_vm0, %v464_v49, 0.0 }
 0x6be   :  { %469 = vadd.xlane.f32.xlu2 %v468_v25 }
 0x729   :  { %v467_v27 = vpop.xlane.xlu2 %466 }
 0x72a   :  { %v471_v28 = vmul.f32 %v467_v27, %v1620_v10 }
 0x72c   :  { %v473_v29 = vadd.f32 1e-05, %v471_v28 }
 0x72e   :  { %1492 = vrsqrt.f32 %v473_v29  ;;  %vm481_vm11 = vweird.f32 %v473_v29 }
 0x731   :  { %v470_v31 = vpop.xlane.xlu2 %469 }
 0x732   :  { %v472_v32 = vmul.f32 %v470_v31, %v1620_v10 }
 0x734   :  { %v1493_v33 = vpop.eup %1492  ;;  %v474_v34 = vadd.f32 1e-05, %v472_v32 }
 0x735   :  { %v476_v35 = vmul.f32 %v1493_v33, %v473_v29  ;;  %vm482_vm10 = vweird.f32 %v1493_v33 }
 0x736   :  { %1494 = vrsqrt.f32 %v474_v34  ;;  %vm483_vm12 = vmor %vm481_vm11, %vm482_vm10  ;;  %vm491_vm15 = vweird.f32 %v474_v34 }
 0x737   :  { %v477_v36 = vmul.f32 %v1493_v33, %v476_v35 }
 0x739   :  { %v478_v37 = vmul.f32 0.5, %v477_v36 }
 0x73b   :  { %v479_v38 = vsub.f32 1.5, %v478_v37 }
 0x73c   :  { %v1495_v39 = vpop.eup %1494 }
 0x73d   :  { %v480_v40 = vmul.f32 %v1493_v33, %v479_v38  ;;  %v486_v41 = vmul.f32 %v1495_v39, %v474_v34  ;;  %vm492_vm13 = vweird.f32 %v1495_v39 }
 0x73e   :  { %vm493_vm1 = vmor %vm491_vm15, %vm492_vm13 }
 0x73f   :  { %v487_v42 = vmul.f32 %v1495_v39, %v486_v41  ;;  %v484_v44 = vsel %vm483_vm12, %v1493_v33, %v480_v40 }
 0x740   :  { %v495_v48 = vmul.f32 %v484_v44, %v461_v20 }
 0x741   :  { %v488_v45 = vmul.f32 0.5, %v487_v42 }
 0x742   :  { %v498_v53 = vmul.f32 %v1453_v47, %v495_v48  ;;  %v1410_v48 = vld [vmem:[%s1945_s3 + $0x18] sm:$0xff] }
 0x743   :  { %v489_v46 = vsub.f32 1.5, %v488_v45  ;;  %723 = vmatpush.bf16.msrb.mxu3 %v1410_v48 }
 0x744   :  { %v501_v56 = vadd.f32 %v1454_v52, %v498_v53 }
 0x745   :  { %v490_v50 = vmul.f32 %v1495_v39, %v489_v46 }
 0x747   :  { %v494_v51 = vsel %vm493_vm1, %v1495_v39, %v490_v50 }
 0x748   :  { %v496_v54 = vmul.f32 %v494_v51, %v462_v24 }
 0x74a   :  { %v499_v55 = vmul.f32 %v1453_v47, %v496_v54 }
 0x74c   :  { %v502_v57 = vadd.f32 %v1454_v52, %v499_v55  ;;  %v1409_v52 = vld [vmem:[%s1945_s3 + $0x10] sm:$0xff] }
 0x74d   :  { %724 = vmatpush.bf16.msrb.mxu3 %v1409_v52 }
 0x74e   :  { %v503_v58 = vpack.c.bf16 %v502_v57, %v501_v56 }
 0x750   :  { %1262 = vmatmul.msk.bf16.vlgmr.msra.gmra.mxu1 %vm38_vm0, %v503_v58 }
 0x7cd   :  { %v533_v5 = vpop.f32.mrf.mxu1 }
 0x7ce   :  { %v534_v7 = vadd.f32 %v1455_v3, %v533_v5 }
 0x7d0   :  { %v538_v8 = vmul.f32 %v534_v7, %v534_v7 }
 0x7d2   :  { %v540_v9 = vmul.f32 %v538_v8, %v534_v7  ;;  %v1457_v8 = vld [vmem:[%s1944_s2 + $0x8] ss:$0 sm:$0xff] }
 0x7d4   :  { %v542_v11 = vmul.f32 0.044715, %v540_v9 }
 0x7d5   :  { %v535_v12 = vpop.f32.mrf.mxu1 }
 0x7d6   :  { %v544_v14 = vadd.f32 %v542_v11, %v534_v7  ;;  %v536_v15 = vadd.f32 %v1455_v3, %v535_v12 }
 0x7d8   :  { %v546_v17 = vmul.f32 0.7978846, %v544_v14  ;;  %v539_v18 = vmul.f32 %v536_v15, %v536_v15 }
 0x7da   :  { %v541_v19 = vmul.f32 %v539_v18, %v536_v15  ;;  %1496 = vtanh.f32 %v546_v17 }
 0x7dc   :  { %v543_v20 = vmul.f32 0.044715, %v541_v19 }
 0x7de   :  { %v545_v21 = vadd.f32 %v543_v20, %v536_v15 }
 0x7e0   :  { %v547_v43 = vmul.f32 0.7978846, %v545_v21  ;;  %v1497_v22 = vpop.eup %1496 }
 0x7e1   :  { %v550_v23 = vadd.f32 1.0, %v1497_v22 }
 0x7e2   :  { %1498 = vtanh.f32 %v547_v43 }
 0x7e3   :  { %v552_v25 = vmul.f32 0.5, %v550_v23 }
 0x7e5   :  { %v554_v27 = vmul.f32 %v552_v25, %v534_v7 }
 0x7e8   :  { %v1499_v24 = vpop.eup %1498 }
 0x7e9   :  { %v551_v49 = vadd.f32 1.0, %v1499_v24 }
 0x7eb   :  { %v553_v26 = vmul.f32 0.5, %v551_v49 }
 0x7ed   :  { %v555_v28 = vmul.f32 %v553_v26, %v536_v15  ;;  %v1458_v15 = vld [vmem:[%s1944_s2 + $0x9] ss:$0 sm:$0xff] }
 0x7ef   :  { %v556_v29 = vpack.c.bf16 %v555_v28, %v554_v27 }
 0x7f1   :  { %629 = vmatmul.bf16.vlgmr.msrb.gmra.mxu2 %v556_v29 }
 0x874   :  { %v630_v31 = vpop.f32.mrf.mxu2 }
 0x875   :  { %v635_v32 = vadd.f32 %v630_v31, %v1724_v13 }
 0x877   :  { %v1785_v33 = vadd.f32 %v1456_v30, %v635_v32 }
 0x879   :  { %v646_v34 = vsel %vm38_vm0, %v1785_v33, 0.0 }
 0x87a   :  { %647 = vadd.xlane.f32.xlu2 %v646_v34 }
 0x87c   :  { %v632_v35 = vpop.f32.mrf.mxu2 }
 0x87d   :  { %v636_v36 = vadd.f32 %v632_v35, %v1729_v16 }
 0x87f   :  { %v1790_v37 = vadd.f32 %v1456_v30, %v636_v36 }
 0x881   :  { %v649_v38 = vsel %vm38_vm0, %v1790_v37, 0.0 }
 0x882   :  { %650 = vadd.xlane.f32.xlu0 %v649_v38 }
 0x8ed   :  { %v648_v39 = vpop.xlane.xlu2 %647 }
 0x8ee   :  { %v652_v40 = vmul.f32 %v648_v39, %v1620_v10 }
 0x8f0   :  { %v654_v13 = vsub.f32 %v1785_v33, %v652_v40 }
 0x8f2   :  { %v656_v41 = vmul.f32 %v654_v13, %v654_v13 }
 0x8f4   :  { %v658_v42 = vsel %vm38_vm0, %v656_v41, 0.0 }
 0x8f5   :  { %659 = vadd.xlane.f32.xlu1 %v658_v42  ;;  %v651_v44 = vpop.xlane.xlu0 %650 }
 0x8f6   :  { %v653_v45 = vmul.f32 %v651_v44, %v1620_v10 }
 0x8f8   :  { %v655_v16 = vsub.f32 %v1790_v37, %v653_v45 }
 0x8fa   :  { %v657_v46 = vmul.f32 %v655_v16, %v655_v16 }
 0x8fc   :  { %v661_v47 = vsel %vm38_vm0, %v657_v46, 0.0 }
 0x8fd   :  { %662 = vadd.xlane.f32.xlu2 %v661_v47 }
 0x968   :  { %v660_v50 = vpop.xlane.xlu1 %659 }
 0x969   :  { %v664_v51 = vmul.f32 %v660_v50, %v1620_v10 }
 0x96b   :  { %v666_v53 = vadd.f32 1e-05, %v664_v51 }
 0x96d   :  { %1500 = vrsqrt.f32 %v666_v53  ;;  %vm674_vm3 = vweird.f32 %v666_v53 }
 0x970   :  { %v663_v54 = vpop.xlane.xlu2 %662 }
 0x971   :  { %v665_v55 = vmul.f32 %v663_v54, %v1620_v10 }
 0x973   :  { %v1501_v56 = vpop.eup %1500  ;;  %v667_v57 = vadd.f32 1e-05, %v665_v55 }
 0x974   :  { %v669_v58 = vmul.f32 %v1501_v56, %v666_v53  ;;  %vm675_vm2 = vweird.f32 %v1501_v56 }
 0x975   :  { %1502 = vrsqrt.f32 %v667_v57  ;;  %vm676_vm4 = vmor %vm674_vm3, %vm675_vm2  ;;  %vm684_vm6 = vweird.f32 %v667_v57 }
 0x976   :  { %v670_v59 = vmul.f32 %v1501_v56, %v669_v58 }
 0x978   :  { %v671_v60 = vmul.f32 0.5, %v670_v59 }
 0x97a   :  { %v672_v61 = vsub.f32 1.5, %v671_v60 }
 0x97b   :  { %v1503_v62 = vpop.eup %1502 }
 0x97c   :  { %v673_v63 = vmul.f32 %v1501_v56, %v672_v61  ;;  %v679_v1 = vmul.f32 %v1503_v62, %v667_v57  ;;  %vm685_vm5 = vweird.f32 %v1503_v62 }
 0x97d   :  { %vm686_vm7 = vmor %vm684_vm6, %vm685_vm5 }
 0x97e   :  { %v680_v2 = vmul.f32 %v1503_v62, %v679_v1  ;;  %v677_v3 = vsel %vm676_vm4, %v1501_v56, %v673_v63 }
 0x97f   :  { %v688_v7 = vmul.f32 %v677_v3, %v654_v13 }
 0x980   :  { %v681_v4 = vmul.f32 0.5, %v680_v2 }
 0x981   :  { %v691_v14 = vmul.f32 %v1457_v8, %v688_v7 }
 0x982   :  { %v682_v5 = vsub.f32 1.5, %v681_v4 }
 0x983   :  { %v694_v18 = vadd.f32 %v1458_v15, %v691_v14 }
 0x984   :  { %v683_v9 = vmul.f32 %v1503_v62, %v682_v5 }
 0x986   :  { %v687_v11 = vsel %vm686_vm7, %v1503_v62, %v683_v9 }
 0x987   :  { %v689_v12 = vmul.f32 %v687_v11, %v655_v16 }
 0x989   :  { %v692_v17 = vmul.f32 %v1457_v8, %v689_v12 }
 0x98b   :  { %v695_v19 = vadd.f32 %v1458_v15, %v692_v17 }
 0x98d   :  { %v696_v20 = vpack.c.bf16 %v695_v19, %v694_v18 }
 0x98f   :  { %1307 = vmatmul.msk.bf16.vlgmr.msrb.gmra.mxu3 %vm38_vm0, %v696_v20  ;;  %v1412_v20 = vld [vmem:[%s1946_s4 + $0x18] sm:$0xff] }
 0xa12   :  { %v726_v21 = vpop.f32.mrf.mxu3 }
 0xa13   :  { %v731_v43 = vpack.c.bf16 %v726_v21, %v726_v21 }
 0xa15   :  { %735 = vrot.lane.b32.xlu1 %v731_v43, %s1559_s20  ;;  %v739_v49 = vunpack.c.l.b16 %v731_v43 }
 0xa1a   :  { %v728_v22 = vpop.f32.mrf.mxu3 }
 0xa1b   :  { %v732_v23 = vpack.c.bf16 %v728_v22, %v728_v22 }
 0xa1d   :  { %737 = vrot.lane.b32.xlu2 %v732_v23, %s1559_s20  ;;  %v740_v24 = vunpack.c.l.b16 %v732_v23 }
 0xa1f   :  { %v741_v25 = vpack.c.b16 %v740_v24, %v739_v49 }
 0xa25   :  { %742 = vrot.lane.b32.xlu2 %v741_v25, %s1560_s21 }
 0xa77   :  { %v738_v26 = vpop.permute.xlu2 %737 }
 0xa78   :  { %v765_v30 = vunpack.c.l.b16 %v738_v26 }
 0xa7f   :  { %v743_v27 = vpop.permute.xlu2 %742 }
 0xa80   :  { %v748_v28 = vsel %vm263_vm14, %v743_v27, 0 }
 0xa81   :  { %757 = vmatpush.bf16.xpose.msra.mxu0 %v748_v28  ;;  %v1411_v28 = vld [vmem:[%s1946_s4 + $0x10] sm:$0xff] }
 0xa87   :  { %v736_v29 = vpop.permute.xlu1 %735 }
 0xa88   :  { %v764_v31 = vunpack.c.l.b16 %v736_v29  ;;  %1308 = vmatmul.msk.bf16.vlgmr.msra.gmra.mxu0 %vm263_vm14, %v741_v25 }
 0xa8a   :  { %v766_v32 = vpack.c.b16 %v765_v30, %v764_v31 }
 0xa8c   :  { %767 = vrot.lane.b32.xlu1 %v766_v32, %s1560_s21  ;;  %859 = vrot.lane.b32.xlu2 %v766_v32, %s1562_s24 }
 0xae6   :  { %v860_v34 = vpop.permute.xlu2 %859 }
 0xae7   :  { %872 = vmatpush.bf16.msrb.mxu0 %v860_v34 }
 0xafe   :  { %v768_v35 = vpop.permute.xlu1 %767 }
 0xaff   :  { %v773_v36 = vsel %vm263_vm14, %v768_v35, 0 }
 0xb00   :  { %782 = vmatpush.bf16.xpose.msrb.mxu1 %v773_v36 }
 0xb05   :  { %v759_v38 = vpop.f32.mrf.mxu0 }
 0xb06   :  { %v760_v47 = vadd.f32 %v759_v38, %v1691_v0 }
 0xb07   :  { %1309 = vmatmul.msk.bf16.vlgmr.msrb.gmra.mxu1 %vm263_vm14, %v766_v32 }
 0xb08   :  { %v789_v53 = vsel %vm263_vm14, %v760_v47, -inf  ;;  %924 = vmatpush.bf16.msra.mxu1 %v1412_v20 }
 0xb0c   :  { %925 = vmatpush.bf16.msra.mxu1 %v1411_v28  ;;  %v1421_v28 = vld [vmem:[%s1948_s6 + $0x70] sm:$0xff] }
 0xb0d   :  { %v761_v39 = vpop.f32.mrf.mxu0 }
 0xb0e   :  { %v762_v40 = vadd.f32 %v761_v39, %v1698_v6 }
 0xb10   :  { %v792_v13 = vsel %vm263_vm14, %v762_v40, -inf }
 0xb11   :  { %793 = vmax.xlane.f32.xlu2 %v792_v13 }
 0xb84   :  { %v784_v41 = vpop.f32.mrf.mxu1  ;;  %v794_v42 = vpop.xlane.xlu2 %793 }
 0xb85   :  { %v785_v44 = vadd.f32 %v784_v41, %v1691_v0  ;;  %v802_v45 = vsub.f32 %v762_v40, %v794_v42 }
 0xb87   :  { %v807_v16 = vmul.f32 1.442695, %v802_v45  ;;  %v795_v46 = vsel %vm263_vm14, %v785_v44, -inf }
 0xb88   :  { %796 = vmax.xlane.f32.xlu0 %v795_v46 }
 0xb89   :  { %1504 = vpow2.f32 %v807_v16 }
 0xb8c   :  { %v786_v48 = vpop.f32.mrf.mxu1 }
 0xb8d   :  { %v787_v50 = vadd.f32 %v786_v48, %v1698_v6 }
 0xb8f   :  { %v1505_v51 = vpop.eup %1504  ;;  %v798_v52 = vsel %vm263_vm14, %v787_v50, -inf }
 0xb90   :  { %799 = vmax.xlane.f32.xlu1 %v798_v52  ;;  %790 = vmax.xlane.f32.xlu0 %v789_v53  ;;  %v816_v54 = vsel %vm263_vm14, %v1505_v51, 0.0  ;;  %v826_v11 = vpack.c.bf16 %v1505_v51, %v1505_v51 }
 0xb91   :  { %817 = vadd.xlane.f32.xlu2 %v816_v54 }
 0xb92   :  { %v832_v15 = vunpack.c.l.b16 %v826_v11 }
 0xba4   :  { %834 = vrot.lane.b32.xlu0 %v741_v25, %s1562_s24 }
 0xbfb   :  { %v797_v55 = vpop.xlane.xlu0 %796 }
 0xbfc   :  { %v803_v56 = vsub.f32 %v785_v44, %v797_v55 }
 0xbfe   :  { %v809_v57 = vmul.f32 1.442695, %v803_v56 }
 0xc00   :  { %1506 = vpow2.f32 %v809_v57 }
 0xc03   :  { %v800_v0 = vpop.xlane.xlu1 %799  ;;  %v791_v58 = vpop.xlane.xlu0 %790 }
 0xc04   :  { %v804_v59 = vsub.f32 %v787_v50, %v800_v0  ;;  %v801_v6 = vsub.f32 %v760_v47, %v791_v58  ;;  %v818_v30 = vpop.xlane.xlu2 %817  ;;  %v1414_v58 = vld [vmem:[%s1947_s5 + $0x18] sm:$0xff] }
 0xc05   :  { %1012 = vmatpush.bf16.msra.mxu2 %v1414_v58 }
 0xc06   :  { %v1507_v60 = vpop.eup %1506  ;;  %v811_v61 = vmul.f32 1.442695, %v804_v59  ;;  %v805_v62 = vmul.f32 1.442695, %v801_v6 }
 0xc07   :  { %v819_v63 = vsel %vm263_vm14, %v1507_v60, 0.0  ;;  %v827_v1 = vpack.c.bf16 %v1507_v60, %v1507_v60 }
 0xc08   :  { %1508 = vpow2.f32 %v811_v61  ;;  %820 = vadd.xlane.f32.xlu0 %v819_v63  ;;  %v1413_v61 = vld [vmem:[%s1947_s5 + $0x10] sm:$0xff] }
 0xc09   :  { %1510 = vpow2.f32 %v805_v62  ;;  %v856_v8 = vunpack.c.l.b16 %v827_v1  ;;  %1013 = vmatpush.bf16.msra.mxu2 %v1413_v61 }
 0xc0e   :  { %v1509_v2 = vpop.eup %1508 }
 0xc0f   :  { %v1511_v3 = vpop.eup %1510  ;;  %v828_v4 = vpack.c.bf16 %v1509_v2, %v1509_v2  ;;  %v822_v5 = vsel %vm263_vm14, %v1509_v2, 0.0 }
 0xc10   :  { %v825_v7 = vpack.c.bf16 %v1511_v3, %v1511_v3  ;;  %823 = vadd.xlane.f32.xlu1 %v822_v5  ;;  %v813_v18 = vsel %vm263_vm14, %v1511_v3, 0.0 }
 0xc11   :  { %v857_v9 = vunpack.c.l.b16 %v828_v4 }
 0xc12   :  { %v831_v14 = vunpack.c.l.b16 %v825_v7 }
 0xc13   :  { %v858_v12 = vpack.c.b16 %v857_v9, %v856_v8 }
 0xc14   :  { %v833_v19 = vpack.c.b16 %v832_v15, %v831_v14 }
 0xc15   :  { %1311 = vmatmul.msk.bf16.vlgmr.msrb.gmra.mxu0 %vm263_vm14, %v858_v12 }
 0xc16   :  { %v835_v17 = vpop.permute.xlu0 %834 }
 0xc17   :  { %847 = vmatpush.bf16.msra.mxu3 %v835_v17 }
 0xc18   :  { %814 = vadd.xlane.f32.xlu1 %v813_v18  ;;  %v1459_v18 = vld [vmem:[%s1944_s2 + $0xa] ss:$0 sm:$0xff] }
 0xc1a   :  { %1310 = vmatmul.msk.bf16.vlgmr.msra.gmra.mxu3 %vm263_vm14, %v833_v19 }
 0xc7b   :  { %v821_v21 = vpop.xlane.xlu0 %820 }
 0xc7c   :  { %1512 = vrcp.f32 %v821_v21 }
 0xc82   :  { %v1513_v23 = vpop.eup %1512 }
 0xc83   :  { %v824_v43 = vpop.xlane.xlu1 %823 }
 0xc84   :  { %1514 = vrcp.f32 %v824_v43  ;;  %v1460_v43 = vld [vmem:[%s1944_s2 + $0xb] ss:$0 sm:$0xff] }
 0xc85   :  { %1516 = vrcp.f32 %v818_v30  ;;  %v1419_v30 = vld [vmem:[%s1948_s6 + $0x60] sm:$0xff] }
 0xc8a   :  { %v1515_v24 = vpop.eup %1514 }
 0xc8b   :  { %v815_v31 = vpop.xlane.xlu1 %814  ;;  %v1517_v34 = vpop.eup %1516 }
 0xc8c   :  { %1518 = vrcp.f32 %v815_v31  ;;  %v1418_v31 = vld [vmem:[%s1948_s6 + $0x58] sm:$0xff] }
 0xc92   :  { %v874_v22 = vpop.f32.mrf.mxu0  ;;  %v1519_v35 = vpop.eup %1518 }
 0xc93   :  { %v885_v25 = vmul.f32 %v1513_v23, %v874_v22 }
 0xc9a   :  { %v876_v49 = vpop.f32.mrf.mxu0 }
 0xc9b   :  { %v886_v26 = vmul.f32 %v1515_v24, %v876_v49 }
 0xc9d   :  { %v1442_v27 = vpack.i.bf16 %v886_v26, %v885_v25  ;;  %v849_v29 = vpop.f32.mrf.mxu3 }
 0xc9e   :  { %v883_v38 = vmul.f32 %v1519_v35, %v849_v29  ;;  %v1420_v29 = vld [vmem:[%s1948_s6 + $0x68] sm:$0xff] }
 0xc9f   :  { %1443 = vrot.lane.b32.xlu1 %v1442_v27, %s1564_s30  ;;  %v1422_v27 = vld [vmem:[%s1948_s6 + $0x78] sm:$0xff]  ;;  %v1461_v35 = vld [vmem:[%s1944_s2 + $0xc] ss:$0 sm:$0xff] }
 0xca0   :  { %1104 = vmatpush.bf16.msrb.mxu3 %v1422_v27 }
 0xca4   :  { %1105 = vmatpush.bf16.msrb.mxu3 %v1421_v28 }
 0xca5   :  { %v851_v32 = vpop.f32.mrf.mxu3 }
 0xca6   :  { %v884_v39 = vmul.f32 %v1517_v34, %v851_v32  ;;  %v1417_v32 = vld [vmem:[%s1948_s6 + $0x50] sm:$0xff]  ;;  %v1416_v34 = vld [vmem:[%s1948_s6 + $0x48] sm:$0xff] }
 0xca8   :  { %1106 = vmatpush.bf16.msrb.mxu3 %v1420_v29 }
 0xcac   :  { %1107 = vmatpush.bf16.msrb.mxu3 %v1419_v30 }
 0xcb0   :  { %1108 = vmatpush.bf16.msrb.mxu3 %v1418_v31  ;;  %v1463_v31 = vld [vmem:[%s1944_s2 + $0xe] ss:$0 sm:$0xff] }
 0xcb4   :  { %1109 = vmatpush.bf16.msrb.mxu3 %v1417_v32 }
 0xcb8   :  { %1110 = vmatpush.bf16.msrb.mxu3 %v1416_v34 }
 0xd11   :  { %v1444_v36 = vpop.permute.xlu1 %1443 }
 0xd12   :  { %v1446_v40 = vunpack.i.h.bf16 %v1444_v36  ;;  %v1445_v13 = vunpack.i.l.bf16 %v1444_v36 }
 0xd14   :  { %v895_v41 = vsel %vm263_vm14, %v883_v38, %v1445_v13  ;;  %v896_v42 = vsel %vm263_vm14, %v884_v39, %v1446_v40  ;;  %v1415_v38 = vld [vmem:[%s1948_s6 + $0x40] sm:$0xff] }
 0xd15   :  { %v897_v44 = vpack.c.bf16 %v896_v42, %v895_v41  ;;  %1111 = vmatpush.bf16.msrb.mxu3 %v1415_v38 }
 0xd17   :  { %1324 = vmatmul.msk.bf16.vlgmr.msra.gmra.mxu1 %vm38_vm0, %v897_v44 }
 0xd94   :  { %v927_v45 = vpop.f32.mrf.mxu1 }
 0xd95   :  { %v1850_v16 = vadd.f32 %v927_v45, %v1785_v33 }
 0xd97   :  { %v934_v46 = vsel %vm38_vm0, %v1850_v16, 0.0 }
 0xd98   :  { %935 = vadd.xlane.f32.xlu2 %v934_v46 }
 0xd9c   :  { %v929_v47 = vpop.f32.mrf.mxu1 }
 0xd9d   :  { %v1855_v48 = vadd.f32 %v929_v47, %v1790_v37 }
 0xd9f   :  { %v937_v50 = vsel %vm38_vm0, %v1855_v48, 0.0 }
 0xda0   :  { %938 = vadd.xlane.f32.xlu2 %v937_v50 }
 0xe0b   :  { %v936_v51 = vpop.xlane.xlu2 %935 }
 0xe0c   :  { %v940_v52 = vmul.f32 %v936_v51, %v1620_v10 }
 0xe0e   :  { %v942_v53 = vsub.f32 %v1850_v16, %v940_v52 }
 0xe10   :  { %v944_v54 = vmul.f32 %v942_v53, %v942_v53 }
 0xe12   :  { %v946_v33 = vsel %vm38_vm0, %v944_v54, 0.0 }
 0xe13   :  { %947 = vadd.xlane.f32.xlu2 %v946_v33  ;;  %v939_v55 = vpop.xlane.xlu2 %938 }
 0xe14   :  { %v941_v56 = vmul.f32 %v939_v55, %v1620_v10 }
 0xe16   :  { %v943_v57 = vsub.f32 %v1855_v48, %v941_v56 }
 0xe18   :  { %v945_v37 = vmul.f32 %v943_v57, %v943_v57 }
 0xe1a   :  { %v949_v0 = vsel %vm38_vm0, %v945_v37, 0.0 }
 0xe1b   :  { %950 = vadd.xlane.f32.xlu0 %v949_v0 }
 0xe86   :  { %v948_v59 = vpop.xlane.xlu2 %947 }
 0xe87   :  { %v952_v6 = vmul.f32 %v948_v59, %v1620_v10 }
 0xe89   :  { %v954_v60 = vadd.f32 1e-05, %v952_v6  ;;  %v1462_v6 = vld [vmem:[%s1944_s2 + $0xd] ss:$0 sm:$0xff] }
 0xe8b   :  { %1520 = vrsqrt.f32 %v954_v60  ;;  %vm962_vm8 = vweird.f32 %v954_v60 }
 0xe8e   :  { %v951_v62 = vpop.xlane.xlu0 %950 }
 0xe8f   :  { %v953_v63 = vmul.f32 %v951_v62, %v1620_v10 }
 0xe91   :  { %v1521_v1 = vpop.eup %1520  ;;  %v955_v2 = vadd.f32 1e-05, %v953_v63 }
 0xe92   :  { %v957_v3 = vmul.f32 %v1521_v1, %v954_v60  ;;  %vm963_vm14 = vweird.f32 %v1521_v1 }
 0xe93   :  { %1522 = vrsqrt.f32 %v955_v2  ;;  %vm964_vm9 = vmor %vm962_vm8, %vm963_vm14  ;;  %vm972_vm11 = vweird.f32 %v955_v2 }
 0xe94   :  { %v958_v4 = vmul.f32 %v1521_v1, %v957_v3 }
 0xe96   :  { %v959_v5 = vmul.f32 0.5, %v958_v4 }
 0xe98   :  { %v960_v7 = vsub.f32 1.5, %v959_v5 }
 0xe99   :  { %v1523_v8 = vpop.eup %1522 }
 0xe9a   :  { %v961_v9 = vmul.f32 %v1521_v1, %v960_v7  ;;  %v967_v11 = vmul.f32 %v1523_v8, %v955_v2  ;;  %vm973_vm10 = vweird.f32 %v1523_v8 }
 0xe9b   :  { %vm974_vm12 = vmor %vm972_vm11, %vm973_vm10 }
 0xe9c   :  { %v968_v12 = vmul.f32 %v1523_v8, %v967_v11  ;;  %v965_v14 = vsel %vm964_vm9, %v1521_v1, %v961_v9 }
 0xe9d   :  { %v976_v19 = vmul.f32 %v965_v14, %v942_v53 }
 0xe9e   :  { %v969_v15 = vmul.f32 0.5, %v968_v12 }
 0xe9f   :  { %v979_v22 = vmul.f32 %v1459_v18, %v976_v19 }
 0xea0   :  { %v970_v17 = vsub.f32 1.5, %v969_v15 }
 0xea1   :  { %v982_v49 = vadd.f32 %v1460_v43, %v979_v22 }
 0xea2   :  { %v971_v20 = vmul.f32 %v1523_v8, %v970_v17 }
 0xea4   :  { %v975_v21 = vsel %vm974_vm12, %v1523_v8, %v971_v20 }
 0xea5   :  { %v977_v23 = vmul.f32 %v975_v21, %v943_v57  ;;  %v1423_v21 = vld [vmem:[%s1949_s7] sm:$0xff] }
 0xea7   :  { %v980_v24 = vmul.f32 %v1459_v18, %v977_v23 }
 0xea9   :  { %v983_v25 = vadd.f32 %v1460_v43, %v980_v24 }
 0xeab   :  { %v984_v26 = vpack.c.bf16 %v983_v25, %v982_v49 }
 0xead   :  { %1337 = vmatmul.msk.bf16.vlgmr.msra.gmra.mxu2 %vm38_vm0, %v984_v26 }
 0xf30   :  { %v1015_v36 = vpop.f32.mrf.mxu2 }
 0xf31   :  { %v1016_v39 = vadd.f32 %v1461_v35, %v1015_v36 }
 0xf33   :  { %v1020_v40 = vmul.f32 %v1016_v39, %v1016_v39 }
 0xf35   :  { %v1022_v13 = vmul.f32 %v1020_v40, %v1016_v39 }
 0xf37   :  { %v1024_v41 = vmul.f32 0.044715, %v1022_v13 }
 0xf38   :  { %v1017_v42 = vpop.f32.mrf.mxu2 }
 0xf39   :  { %v1026_v44 = vadd.f32 %v1024_v41, %v1016_v39  ;;  %v1018_v45 = vadd.f32 %v1461_v35, %v1017_v42 }
 0xf3b   :  { %v1028_v46 = vmul.f32 0.7978846, %v1026_v44  ;;  %v1021_v47 = vmul.f32 %v1018_v45, %v1018_v45 }
 0xf3d   :  { %v1023_v50 = vmul.f32 %v1021_v47, %v1018_v45  ;;  %1524 = vtanh.f32 %v1028_v46 }
 0xf3f   :  { %v1025_v51 = vmul.f32 0.044715, %v1023_v50 }
 0xf41   :  { %v1027_v52 = vadd.f32 %v1025_v51, %v1018_v45  ;;  %v1465_v51 = vld [vmem:[%s1944_s2 + $0x10] ss:$0 sm:$0xff] }
 0xf43   :  { %v1029_v53 = vmul.f32 0.7978846, %v1027_v52  ;;  %v1525_v54 = vpop.eup %1524 }
 0xf44   :  { %v1032_v33 = vadd.f32 1.0, %v1525_v54 }
 0xf45   :  { %1526 = vtanh.f32 %v1029_v53 }
 0xf46   :  { %v1034_v56 = vmul.f32 0.5, %v1032_v33 }
 0xf48   :  { %v1036_v0 = vmul.f32 %v1034_v56, %v1016_v39 }
 0xf4b   :  { %v1527_v55 = vpop.eup %1526 }
 0xf4c   :  { %v1033_v57 = vadd.f32 1.0, %v1527_v55 }
 0xf4e   :  { %v1035_v37 = vmul.f32 0.5, %v1033_v57 }
 0xf50   :  { %v1037_v58 = vmul.f32 %v1035_v37, %v1018_v45 }
 0xf52   :  { %v1038_v59 = vpack.c.bf16 %v1037_v58, %v1036_v0 }
 0xf54   :  { %1112 = vmatmul.bf16.vlgmr.msrb.gmra.mxu3 %v1038_v59 }
 0xfd7   :  { %v1113_v60 = vpop.f32.mrf.mxu3 }
 0xfd8   :  { %v1118_v61 = vadd.f32 %v1113_v60, %v1850_v16 }
 0xfda   :  { %v1121_v62 = vadd.f32 %v1462_v6, %v1118_v61 }
 0xfdc   :  { %v1123_v63 = vsel %vm38_vm0, %v1121_v62, 0.0 }
 0xfdd   :  { %1124 = vadd.xlane.f32.xlu1 %v1123_v63 }
 0xfdf   :  { %v1115_v1 = vpop.f32.mrf.mxu3 }
 0xfe0   :  { %v1119_v2 = vadd.f32 %v1115_v1, %v1855_v48  ;;  %v1424_v48 = vld [vmem:[%s1949_s7 + $0x8] sm:$0xff] }
 0xfe1   :  { %1200 = vmatpush.bf16.msra.mxu0 %v1424_v48 }
 0xfe2   :  { %v1122_v3 = vadd.f32 %v1462_v6, %v1119_v2 }
 0xfe4   :  { %v1126_v4 = vsel %vm38_vm0, %v1122_v3, 0.0 }
 0xfe5   :  { %1127 = vadd.xlane.f32.xlu2 %v1126_v4  ;;  %1201 = vmatpush.bf16.msra.mxu0 %v1423_v21 }
0x1050   :  { %v1125_v5 = vpop.xlane.xlu1 %1124 }
0x1051   :  { %v1129_v7 = vmul.f32 %v1125_v5, %v1620_v10 }
0x1053   :  { %v1131_v8 = vsub.f32 %v1121_v62, %v1129_v7 }
0x1055   :  { %v1133_v9 = vmul.f32 %v1131_v8, %v1131_v8 }
0x1057   :  { %v1135_v11 = vsel %vm38_vm0, %v1133_v9, 0.0 }
0x1058   :  { %1136 = vadd.xlane.f32.xlu0 %v1135_v11  ;;  %v1128_v16 = vpop.xlane.xlu2 %1127 }
0x1059   :  { %v1130_v12 = vmul.f32 %v1128_v16, %v1620_v10 }
0x105b   :  { %v1132_v14 = vsub.f32 %v1122_v3, %v1130_v12 }
0x105d   :  { %v1134_v15 = vmul.f32 %v1132_v14, %v1132_v14 }
0x105f   :  { %v1138_v17 = vsel %vm38_vm0, %v1134_v15, 0.0 }
0x1060   :  { %1139 = vadd.xlane.f32.xlu2 %v1138_v17 }
0x10cb   :  { %v1137_v18 = vpop.xlane.xlu0 %1136 }
0x10cc   :  { %v1141_v19 = vmul.f32 %v1137_v18, %v1620_v10 }
0x10ce   :  { %v1143_v20 = vadd.f32 1e-05, %v1141_v19 }
0x10d0   :  { %1528 = vrsqrt.f32 %v1143_v20  ;;  %vm1151_vm15 = vweird.f32 %v1143_v20 }
0x10d3   :  { %v1140_v43 = vpop.xlane.xlu2 %1139 }
0x10d4   :  { %v1142_v22 = vmul.f32 %v1140_v43, %v1620_v10  ;;  %v1464_v10 = vld [vmem:[%s1944_s2 + $0xf] ss:$0 sm:$0xff] }
0x10d6   :  { %v1529_v23 = vpop.eup %1528  ;;  %v1144_v24 = vadd.f32 1e-05, %v1142_v22 }
0x10d7   :  { %v1146_v49 = vmul.f32 %v1529_v23, %v1143_v20  ;;  %vm1152_vm13 = vweird.f32 %v1529_v23 }
0x10d8   :  { %1530 = vrsqrt.f32 %v1144_v24  ;;  %vm1153_vm1 = vmor %vm1151_vm15, %vm1152_vm13  ;;  %vm1161_vm3 = vweird.f32 %v1144_v24 }
0x10d9   :  { %v1147_v25 = vmul.f32 %v1529_v23, %v1146_v49 }
0x10db   :  { %v1148_v26 = vmul.f32 0.5, %v1147_v25 }
0x10dd   :  { %v1149_v27 = vsub.f32 1.5, %v1148_v26 }
0x10de   :  { %v1531_v28 = vpop.eup %1530 }
0x10df   :  { %v1150_v29 = vmul.f32 %v1529_v23, %v1149_v27  ;;  %v1156_v30 = vmul.f32 %v1531_v28, %v1144_v24  ;;  %vm1162_vm2 = vweird.f32 %v1531_v28 }
0x10e0   :  { %vm1163_vm4 = vmor %vm1161_vm3, %vm1162_vm2 }
0x10e1   :  { %v1154_v32 = vsel %vm1153_vm1, %v1529_v23, %v1150_v29  ;;  %v1157_v34 = vmul.f32 %v1531_v28, %v1156_v30 }
0x10e2   :  { %v1165_v35 = vmul.f32 %v1154_v32, %v1131_v8 }
0x10e3   :  { %v1158_v36 = vmul.f32 0.5, %v1157_v34 }
0x10e4   :  { %v1168_v38 = vmul.f32 %v1463_v31, %v1165_v35 }
0x10e5   :  { %v1159_v39 = vsub.f32 1.5, %v1158_v36 }
0x10e6   :  { %v1171_v40 = vadd.f32 %v1464_v10, %v1168_v38 }
0x10e7   :  { %v1160_v13 = vmul.f32 %v1531_v28, %v1159_v39 }
0x10e8   :  { %v1208_v41 = vsel %vm38_vm0, %v1171_v40, 0.0 }
0x10e9   :  { %1211 = vst [vmem:[#allocation2 + $0x8] sm:$0xff] %v1208_v41  ;;  %v1164_v42 = vsel %vm1163_vm4, %v1531_v28, %v1160_v13 }
0x10ea   :  { %v1166_v44 = vmul.f32 %v1164_v42, %v1132_v14 }
0x10ec   :  { %v1169_v45 = vmul.f32 %v1463_v31, %v1166_v44 }
0x10ee   :  { %v1172_v46 = vadd.f32 %v1464_v10, %v1169_v45 }
0x10f0   :  { %v1209_v47 = vsel %vm38_vm0, %v1172_v46, 0.0  ;;  %v1173_v50 = vpack.c.bf16 %v1172_v46, %v1171_v40 }
0x10f1   :  { %1213 = vst [vmem:[#allocation2 + $0x18] sm:$0xff] %v1209_v47 }
0x10f2   :  { %1394 = vmatmul.msk.bf16.vlgmr.msra.gmra.mxu0 %vm38_vm0, %v1173_v50 }
0x116f   :  { %v1203_v52 = vpop.f32.mrf.mxu0 }
0x1170   :  { %v1204_v53 = vadd.f32 %v1465_v51, %v1203_v52 }
0x1172   :  { %1210 = vst [vmem:[#allocation2] sm:$0xff] %v1204_v53 }
0x1177   :  { %v1205_v54 = vpop.f32.mrf.mxu0 }
0x1178   :  { %v1206_v33 = vadd.f32 %v1465_v51, %v1205_v54 }
0x117a   :  { %1212 = vst [vmem:[#allocation2 + $0x10] sm:$0xff] %v1206_v33 }
0x117b   :  { %1226 = dma.vmem_to_hbm [thread:$0]  %s1219_s15, 512, %s1221_s18, [#allocation3], %s1566_s19, %s1566_s19, %s1564_s30  }
0x117c   :  { %1556 = dma.done.wait [#allocation3], 512  }
0x117d   :  { %1557 = vsyncadd [#allocation3], 4294966784 }
0x117e   :  { %1231 = vsyncpa [#allocation3], 1 }

</bundles_post_ra>
